<compile_context>
chip_gen: v6e
topology: v6e:2x2x1
jax: 0.10.0
libtpu: 0.0.40
codegen_flags: <defaults>
</compile_context>

<pallas_src>
import jax
import jax.numpy as jnp
from jax.experimental import pallas as pl
from jax.experimental.pallas import tpu as pltpu

HIGHEST = jax.lax.Precision.HIGHEST


# ----------------------------- fused Pallas kernel ---------------------------

def _make_fused_decoder_kernel(n_layers, batch, emb_dim, hidden_dim, vocab):
    B, E, H, V, L = batch, emb_dim, hidden_dim, vocab, n_layers

    def kernel(ids_ref, emb_ref, h_ref, c_ref, w_ref, b_ref, fc_w_ref, fc_b_ref,
               pred_ref, h_out_ref, c_out_ref):
        # ---- embedding gather as a one-hot MXU matmul -------------------------
        ids = ids_ref[...]                                          # (B, 1) i32
        vocab_lane = jax.lax.broadcasted_iota(jnp.int32, (B, V), 1)
        onehot = (vocab_lane == ids).astype(jnp.float32)            # (B, V)
        x = jnp.dot(onehot, emb_ref[...],
                    preferred_element_type=jnp.float32, precision=HIGHEST)
        # TODO(synk): training-mode dropout on the embedding not implemented
        # (eval mode == identity).

        h_slab = h_ref[...]                                         # (B, L*H)
        c_slab = c_ref[...]                                         # (B, L*H)

        # load each layer's packed [W_ih; W_hh] (2H, 4H) and bias (1, 4H) once
        w_layers = [w_ref[l] for l in range(L)]
        b_layers = [b_ref[l] for l in range(L)]

        # ---- hoisted, loop-independent h_prev @ W_hh (+ bias) -----------------
        # Every layer's recurrent-state contribution only depends on the input
        # state, so it is computed up front, off the serial layer chain.
        hid_gates = []
        for l in range(L):
            h_prev = h_slab[:, l * H:(l + 1) * H]                   # (B, H)
            hg = jnp.dot(h_prev, w_layers[l][H:, :],
                         preferred_element_type=jnp.float32,
                         precision=HIGHEST) + b_layers[l]
            hid_gates.append(hg)                                     # (B, 4H)

        # lanes [2H, 3H) are the tanh ("g") gate; the i/f/o weight & bias
        # columns were pre-scaled by 0.5 at pack time so that
        # sigmoid(raw) == 0.5 * tanh(raw / 2) + 0.5 == 0.5 * t + 0.5.
        lane = jax.lax.broadcasted_iota(jnp.int32, (B, 4 * H), 1)
        g_lane = (lane >= 2 * H) & (lane < 3 * H)

        h_parts, c_parts = [], []
        for l in range(L):                                           # static unroll
            gates = jnp.dot(x, w_layers[l][:H, :],
                            preferred_element_type=jnp.float32,
                            precision=HIGHEST) + hid_gates[l]
            t = jnp.tanh(gates)                                      # one EUP pass
            z = jnp.where(g_lane, t, 0.5 * t + 0.5)
            i_ = z[:, 0 * H:1 * H]
            f_ = z[:, 1 * H:2 * H]
            g_ = z[:, 2 * H:3 * H]
            o_ = z[:, 3 * H:4 * H]

            c_prev = c_slab[:, l * H:(l + 1) * H]
            c_new = f_ * c_prev + i_ * g_
            h_new = o_ * jnp.tanh(c_new)
            h_parts.append(h_new)
            c_parts.append(c_new)
            x = h_new            # inter-layer dropout == identity (eval mode)

        # ---- lane-dense single writeback of the new state ---------------------
        h_out_ref[...] = jnp.concatenate(h_parts, axis=1)            # (B, L*H)
        c_out_ref[...] = jnp.concatenate(c_parts, axis=1)            # (B, L*H)

        # ---- output projection -------------------------------------------------
        pred_ref[...] = (jnp.dot(x, fc_w_ref[...],
                                 preferred_element_type=jnp.float32,
                                 precision=HIGHEST) + fc_b_ref[...])

    return kernel


# ----------------------------- kernel wrappers --------------------------------

def decoder_lstm_step_slab(packed, ids, h_slab, c_slab):
    """Single decode step on lane-dense state slabs (B, L*H). Use this directly
    inside a decode loop so the state never leaves the slab layout."""
    B = ids.shape[0]
    L, two_h, four_h = packed["w"].shape
    H = four_h // 4
    E = packed["embedding"].shape[1]
    V = packed["fc_w"].shape[1]

    kernel = _make_fused_decoder_kernel(L, B, E, H, V)
    vmem = lambda: pl.BlockSpec(memory_space=pltpu.MemorySpace.VMEM)

    # Advisory cost hint so XLA schedules this tiny fused custom call sensibly.
    flops = (2 * B * V * E                 # one-hot embedding matmul
             + L * 2 * B * H * 4 * H * 2   # per-layer x@W_ih + h@W_hh
             + 2 * B * H * V)              # fc
    transcendentals = L * (B * 4 * H + B * H)
    bytes_accessed = 4 * (packed["embedding"].size + packed["w"].size
                          + packed["b"].size + packed["fc_w"].size
                          + packed["fc_b"].size
                          + 2 * h_slab.size + 2 * c_slab.size + B * V + B)

    pred, h_out, c_out = pl.pallas_call(
        kernel,
        out_shape=(jax.ShapeDtypeStruct((B, V), jnp.float32),
                   jax.ShapeDtypeStruct((B, L * H), jnp.float32),
                   jax.ShapeDtypeStruct((B, L * H), jnp.float32)),
        in_specs=[vmem() for _ in range(8)],
        out_specs=(vmem(), vmem(), vmem()),
        cost_estimate=pl.CostEstimate(flops=flops,
                                      transcendentals=transcendentals,
                                      bytes_accessed=bytes_accessed),
    )(ids.reshape(B, 1).astype(jnp.int32), packed["embedding"],
      h_slab, c_slab, packed["w"], packed["b"],
      packed["fc_w"], packed["fc_b"])
    return pred, h_out, c_out


def decoder_lstm_forward(packed, x, h_n, c_n):
    """PyTorch-faithful interface: x (B,) int32, h_n/c_n (n_layers, B, H).
    Layout conversion to/from the lane-dense slab happens only here (the decode
    loop should call decoder_lstm_step_slab directly)."""
    L, B, H = h_n.shape
    h_slab = h_n.transpose(1, 0, 2).reshape(B, L * H)
    c_slab = c_n.transpose(1, 0, 2).reshape(B, L * H)
    pred, h_out_slab, c_out_slab = decoder_lstm_step_slab(packed, x, h_slab, c_slab)
    h_out = h_out_slab.reshape(B, L, H).transpose(1, 0, 2)
    c_out = c_out_slab.reshape(B, L, H).transpose(1, 0, 2)
    return pred, h_out, c_out


# ----------------------------- parameter init / packing -----------------------

def init_params(key, output_vocab, emb_dim, hidden_dim, n_layers):
    """Raw (PyTorch-equivalent) parameters, used by the reference."""
    keys = jax.random.split(key, 3 + 4 * n_layers)
    bound = 1.0 / (hidden_dim ** 0.5)
    params = {}
    # nn.Embedding default init ~ N(0, 1)
    params["embedding"] = jax.random.normal(keys[0], (output_vocab, emb_dim),
                                            jnp.float32)
    # nn.LSTM default init ~ U(-1/sqrt(H), 1/sqrt(H)); store transposed weights
    # and the summed bias (b_ih + b_hh). Gate order: i, f, g, o.
    lstm = []
    for l in range(n_layers):
        din = emb_dim if l == 0 else hidden_dim
        k0, k1, k2, k3 = keys[1 + 4 * l: 5 + 4 * l]
        w_ih = jax.random.uniform(k0, (din, 4 * hidden_dim), jnp.float32, -bound, bound)
        w_hh = jax.random.uniform(k1, (hidden_dim, 4 * hidden_dim), jnp.float32, -bound, bound)
        b_ih = jax.random.uniform(k2, (4 * hidden_dim,), jnp.float32, -bound, bound)
        b_hh = jax.random.uniform(k3, (4 * hidden_dim,), jnp.float32, -bound, bound)
        lstm.append((w_ih, w_hh, (b_ih + b_hh).reshape(1, 4 * hidden_dim)))
    params["lstm"] = lstm
    # nn.Linear default init ~ U(-1/sqrt(in), 1/sqrt(in)); store transposed.
    kw, kb = keys[1 + 4 * n_layers], keys[2 + 4 * n_layers]
    params["fc_w"] = jax.random.uniform(kw, (hidden_dim, output_vocab), jnp.float32, -bound, bound)
    params["fc_b"] = jax.random.uniform(kb, (1, output_vocab), jnp.float32, -bound, bound)
    return params


def pack_params(params):
    """Kernel-side packing: stacked (L, 2H, 4H) [W_ih; W_hh] + (L, 1, 4H) bias,
    with i/f/o gate columns pre-scaled by 0.5 (single-tanh gate activation)."""
    lstm = params["lstm"]
    L = len(lstm)
    H = lstm[0][1].shape[0]
    E = lstm[0][0].shape[0]
    # TODO(synk): stacked packing assumes emb_dim == hidden_dim (true here); a
    # separate layer-0 W_ih input would be needed for the general case.
    assert E == H, "packed kernel path requires emb_dim == hidden_dim"
    scale = jnp.ones((4 * H,), jnp.float32)
    scale = scale.at[0:2 * H].set(0.5).at[3 * H:4 * H].set(0.5)   # i, f, o
    w_stack = jnp.stack([jnp.concatenate([w_ih, w_hh], axis=0) * scale
                         for (w_ih, w_hh, _) in lstm], axis=0)     # (L, 2H, 4H)
    b_stack = jnp.stack([b * scale for (_, _, b) in lstm], axis=0)  # (L, 1, 4H)
    return {"embedding": params["embedding"], "w": w_stack, "b": b_stack,
            "fc_w": params["fc_w"], "fc_b": params["fc_b"]}


# ----------------------------- pure-JAX reference ----------------------------

def decoder_lstm_reference(params, x, h_n, c_n):
    H = h_n.shape[-1]
    layer_in = params["embedding"][x]
    new_h, new_c = [], []
    for l, (w_ih, w_hh, b) in enumerate(params["lstm"]):
        gates = (jnp.dot(layer_in, w_ih, precision=HIGHEST)
                 + jnp.dot(h_n[l], w_hh, precision=HIGHEST) + b)
        i = jax.nn.sigmoid(gates[:, 0 * H:1 * H])
        f = jax.nn.sigmoid(gates[:, 1 * H:2 * H])
        g = jnp.tanh(gates[:, 2 * H:3 * H])
        o = jax.nn.sigmoid(gates[:, 3 * H:4 * H])
        c = f * c_n[l] + i * g
        h = o * jnp.tanh(c)
        new_h.append(h)
        new_c.append(c)
        layer_in = h
    pred = jnp.dot(layer_in, params["fc_w"], precision=HIGHEST) + params["fc_b"]
    return pred, jnp.stack(new_h, axis=0), jnp.stack(new_c, axis=0)


# ----------------------------- main -------------------------------------------

if __name__ == "__main__":
    OUTPUT_VOCAB = 256
    EMB_DIM = 32
    HIDDEN_DIM = 32
    N_LAYERS = 4
    BATCH = 8

    root = jax.random.PRNGKey(0)
    k_par, k_x, k_h, k_c = jax.random.split(root, 4)

    params = init_params(k_par, OUTPUT_VOCAB, EMB_DIM, HIDDEN_DIM, N_LAYERS)
    packed = pack_params(params)
    x = jax.random.randint(k_x, (BATCH,), 0, OUTPUT_VOCAB, dtype=jnp.int32)
    h_n = jax.random.normal(k_h, (N_LAYERS, BATCH, HIDDEN_DIM), jnp.float32)
    c_n = jax.random.normal(k_c, (N_LAYERS, BATCH, HIDDEN_DIM), jnp.float32)

    fwd = jax.jit(lambda x, h, c: decoder_lstm_forward(packed, x, h, c))
    pred, h_out, c_out = fwd(x, h_n, c_n)
    jax.block_until_ready((pred, h_out, c_out))

    assert pred.shape == (BATCH, OUTPUT_VOCAB)
    assert h_out.shape == (N_LAYERS, BATCH, HIDDEN_DIM)
    assert c_out.shape == (N_LAYERS, BATCH, HIDDEN_DIM)

    # correctness check vs. pure-JAX reference (all dots at HIGHEST precision)
    pred_r, h_r, c_r = decoder_lstm_reference(params, x, h_n, c_n)
    assert jnp.allclose(pred, pred_r, atol=1e-4, rtol=1e-4)
    assert jnp.allclose(h_out, h_r, atol=1e-4, rtol=1e-4)
    assert jnp.allclose(c_out, c_r, atol=1e-4, rtol=1e-4)

    print("KERNEL_OK")
</pallas_src>

<mosaic_0001>
module attributes {stable_mosaic.version = 11 : i64} {
  func.func @kernel(%arg0: memref<8x1xi32, #tpu.memory_space<vmem>>, %arg1: memref<256x32xf32, #tpu.memory_space<vmem>>, %arg2: memref<8x128xf32, #tpu.memory_space<vmem>>, %arg3: memref<8x128xf32, #tpu.memory_space<vmem>>, %arg4: memref<4x64x128xf32, #tpu.memory_space<vmem>>, %arg5: memref<4x1x128xf32, #tpu.memory_space<vmem>>, %arg6: memref<32x256xf32, #tpu.memory_space<vmem>>, %arg7: memref<1x256xf32, #tpu.memory_space<vmem>>, %arg8: memref<8x256xf32, #tpu.memory_space<vmem>>, %arg9: memref<8x128xf32, #tpu.memory_space<vmem>>, %arg10: memref<8x128xf32, #tpu.memory_space<vmem>>) attributes {dimension_semantics = [], scalar_prefetch = 0 : i64, scratch_operands = 0 : i64, tpu.core_type = #tpu.core_type<tc>} {
    %c0 = arith.constant 0 : index
    %c0_0 = arith.constant 0 : index
    %0 = vector.load %arg0[%c0, %c0_0] : memref<8x1xi32, #tpu.memory_space<vmem>>, vector<8x1xi32>
    %1 = tpu.iota {dimensions = array<i32: 1>} : vector<8x256xi32>
    %2 = vector.broadcast %0 : vector<8x1xi32> to vector<8x256xi32>
    %3 = arith.cmpi eq, %1, %2 : vector<8x256xi32>
    %4 = arith.extui %3 : vector<8x256xi1> to vector<8x256xi32>
    %5 = arith.sitofp %4 : vector<8x256xi32> to vector<8x256xf32>
    %c0_1 = arith.constant 0 : index
    %c0_2 = arith.constant 0 : index
    %6 = vector.load %arg1[%c0_1, %c0_2] : memref<256x32xf32, #tpu.memory_space<vmem>>, vector<256x32xf32>
    %cst = arith.constant dense<0.000000e+00> : vector<8x32xf32>
    %7 = tpu.matmul %5, %6, %cst {dimension_numbers = #tpu.dot_dimension_numbers<[1], [0], [0], [1], [0, 0, 1, 1], [], []>, precision = #tpu.contract_precision<fp32>} : vector<8x256xf32>, vector<256x32xf32>, vector<8x32xf32> -> vector<8x32xf32>
    %c0_3 = arith.constant 0 : index
    %c0_4 = arith.constant 0 : index
    %8 = vector.load %arg2[%c0_3, %c0_4] : memref<8x128xf32, #tpu.memory_space<vmem>>, vector<8x128xf32>
    %c0_5 = arith.constant 0 : index
    %c0_6 = arith.constant 0 : index
    %9 = vector.load %arg3[%c0_5, %c0_6] : memref<8x128xf32, #tpu.memory_space<vmem>>, vector<8x128xf32>
    %c0_7 = arith.constant 0 : index
    %c0_8 = arith.constant 0 : index
    %c0_9 = arith.constant 0 : index
    %10 = vector.load %arg4[%c0_7, %c0_8, %c0_9] : memref<4x64x128xf32, #tpu.memory_space<vmem>>, vector<1x64x128xf32>
    %11 = vector.shape_cast %10 : vector<1x64x128xf32> to vector<64x128xf32>
    %c1 = arith.constant 1 : index
    %c0_10 = arith.constant 0 : index
    %c0_11 = arith.constant 0 : index
    %12 = vector.load %arg4[%c1, %c0_10, %c0_11] : memref<4x64x128xf32, #tpu.memory_space<vmem>>, vector<1x64x128xf32>
    %13 = vector.shape_cast %12 : vector<1x64x128xf32> to vector<64x128xf32>
    %c2 = arith.constant 2 : index
    %c0_12 = arith.constant 0 : index
    %c0_13 = arith.constant 0 : index
    %14 = vector.load %arg4[%c2, %c0_12, %c0_13] : memref<4x64x128xf32, #tpu.memory_space<vmem>>, vector<1x64x128xf32>
    %15 = vector.shape_cast %14 : vector<1x64x128xf32> to vector<64x128xf32>
    %c3 = arith.constant 3 : index
    %c0_14 = arith.constant 0 : index
    %c0_15 = arith.constant 0 : index
    %16 = vector.load %arg4[%c3, %c0_14, %c0_15] : memref<4x64x128xf32, #tpu.memory_space<vmem>>, vector<1x64x128xf32>
    %17 = vector.shape_cast %16 : vector<1x64x128xf32> to vector<64x128xf32>
    %c0_16 = arith.constant 0 : index
    %c0_17 = arith.constant 0 : index
    %c0_18 = arith.constant 0 : index
    %18 = vector.load %arg5[%c0_16, %c0_17, %c0_18] : memref<4x1x128xf32, #tpu.memory_space<vmem>>, vector<1x1x128xf32>
    %19 = vector.shape_cast %18 : vector<1x1x128xf32> to vector<1x128xf32>
    %c1_19 = arith.constant 1 : index
    %c0_20 = arith.constant 0 : index
    %c0_21 = arith.constant 0 : index
    %20 = vector.load %arg5[%c1_19, %c0_20, %c0_21] : memref<4x1x128xf32, #tpu.memory_space<vmem>>, vector<1x1x128xf32>
    %21 = vector.shape_cast %20 : vector<1x1x128xf32> to vector<1x128xf32>
    %c2_22 = arith.constant 2 : index
    %c0_23 = arith.constant 0 : index
    %c0_24 = arith.constant 0 : index
    %22 = vector.load %arg5[%c2_22, %c0_23, %c0_24] : memref<4x1x128xf32, #tpu.memory_space<vmem>>, vector<1x1x128xf32>
    %23 = vector.shape_cast %22 : vector<1x1x128xf32> to vector<1x128xf32>
    %c3_25 = arith.constant 3 : index
    %c0_26 = arith.constant 0 : index
    %c0_27 = arith.constant 0 : index
    %24 = vector.load %arg5[%c3_25, %c0_26, %c0_27] : memref<4x1x128xf32, #tpu.memory_space<vmem>>, vector<1x1x128xf32>
    %25 = vector.shape_cast %24 : vector<1x1x128xf32> to vector<1x128xf32>
    %26 = vector.extract_strided_slice %8 {offsets = [0, 0], sizes = [8, 32], strides = [1, 1]} : vector<8x128xf32> to vector<8x32xf32>
    %27 = vector.extract_strided_slice %11 {offsets = [32, 0], sizes = [32, 128], strides = [1, 1]} : vector<64x128xf32> to vector<32x128xf32>
    %cst_28 = arith.constant dense<0.000000e+00> : vector<8x128xf32>
    %28 = tpu.matmul %26, %27, %cst_28 {dimension_numbers = #tpu.dot_dimension_numbers<[1], [0], [0], [1], [0, 0, 1, 1], [], []>, precision = #tpu.contract_precision<fp32>} : vector<8x32xf32>, vector<32x128xf32>, vector<8x128xf32> -> vector<8x128xf32>
    %29 = vector.broadcast %19 : vector<1x128xf32> to vector<8x128xf32>
    %30 = arith.addf %28, %29 : vector<8x128xf32>
    %31 = vector.extract_strided_slice %8 {offsets = [0, 32], sizes = [8, 32], strides = [1, 1]} : vector<8x128xf32> to vector<8x32xf32>
    %32 = vector.extract_strided_slice %13 {offsets = [32, 0], sizes = [32, 128], strides = [1, 1]} : vector<64x128xf32> to vector<32x128xf32>
    %cst_29 = arith.constant dense<0.000000e+00> : vector<8x128xf32>
    %33 = tpu.matmul %31, %32, %cst_29 {dimension_numbers = #tpu.dot_dimension_numbers<[1], [0], [0], [1], [0, 0, 1, 1], [], []>, precision = #tpu.contract_precision<fp32>} : vector<8x32xf32>, vector<32x128xf32>, vector<8x128xf32> -> vector<8x128xf32>
    %34 = vector.broadcast %21 : vector<1x128xf32> to vector<8x128xf32>
    %35 = arith.addf %33, %34 : vector<8x128xf32>
    %36 = vector.extract_strided_slice %8 {offsets = [0, 64], sizes = [8, 32], strides = [1, 1]} : vector<8x128xf32> to vector<8x32xf32>
    %37 = vector.extract_strided_slice %15 {offsets = [32, 0], sizes = [32, 128], strides = [1, 1]} : vector<64x128xf32> to vector<32x128xf32>
    %cst_30 = arith.constant dense<0.000000e+00> : vector<8x128xf32>
    %38 = tpu.matmul %36, %37, %cst_30 {dimension_numbers = #tpu.dot_dimension_numbers<[1], [0], [0], [1], [0, 0, 1, 1], [], []>, precision = #tpu.contract_precision<fp32>} : vector<8x32xf32>, vector<32x128xf32>, vector<8x128xf32> -> vector<8x128xf32>
    %39 = vector.broadcast %23 : vector<1x128xf32> to vector<8x128xf32>
    %40 = arith.addf %38, %39 : vector<8x128xf32>
    %41 = vector.extract_strided_slice %8 {offsets = [0, 96], sizes = [8, 32], strides = [1, 1]} : vector<8x128xf32> to vector<8x32xf32>
    %42 = vector.extract_strided_slice %17 {offsets = [32, 0], sizes = [32, 128], strides = [1, 1]} : vector<64x128xf32> to vector<32x128xf32>
    %cst_31 = arith.constant dense<0.000000e+00> : vector<8x128xf32>
    %43 = tpu.matmul %41, %42, %cst_31 {dimension_numbers = #tpu.dot_dimension_numbers<[1], [0], [0], [1], [0, 0, 1, 1], [], []>, precision = #tpu.contract_precision<fp32>} : vector<8x32xf32>, vector<32x128xf32>, vector<8x128xf32> -> vector<8x128xf32>
    %44 = vector.broadcast %25 : vector<1x128xf32> to vector<8x128xf32>
    %45 = arith.addf %43, %44 : vector<8x128xf32>
    %46 = tpu.iota {dimensions = array<i32: 1>} : vector<8x128xi32>
    %c64_i32 = arith.constant 64 : i32
    %47 = vector.broadcast %c64_i32 : i32 to vector<8x128xi32>
    %48 = arith.cmpi sge, %46, %47 : vector<8x128xi32>
    %c96_i32 = arith.constant 96 : i32
    %49 = vector.broadcast %c96_i32 : i32 to vector<8x128xi32>
    %50 = arith.cmpi slt, %46, %49 : vector<8x128xi32>
    %51 = arith.andi %48, %50 : vector<8x128xi1>
    %52 = vector.extract_strided_slice %11 {offsets = [0, 0], sizes = [32, 128], strides = [1, 1]} : vector<64x128xf32> to vector<32x128xf32>
    %cst_32 = arith.constant dense<0.000000e+00> : vector<8x128xf32>
    %53 = tpu.matmul %7, %52, %cst_32 {dimension_numbers = #tpu.dot_dimension_numbers<[1], [0], [0], [1], [0, 0, 1, 1], [], []>, precision = #tpu.contract_precision<fp32>} : vector<8x32xf32>, vector<32x128xf32>, vector<8x128xf32> -> vector<8x128xf32>
    %54 = arith.addf %53, %30 : vector<8x128xf32>
    %55 = math.tanh %54 : vector<8x128xf32>
    %cst_33 = arith.constant 5.000000e-01 : f32
    %56 = vector.broadcast %cst_33 : f32 to vector<8x128xf32>
    %57 = arith.mulf %56, %55 : vector<8x128xf32>
    %cst_34 = arith.constant 5.000000e-01 : f32
    %58 = vector.broadcast %cst_34 : f32 to vector<8x128xf32>
    %59 = arith.addf %57, %58 : vector<8x128xf32>
    %60 = arith.select %51, %55, %59 : vector<8x128xi1>, vector<8x128xf32>
    %61 = vector.extract_strided_slice %60 {offsets = [0, 0], sizes = [8, 32], strides = [1, 1]} : vector<8x128xf32> to vector<8x32xf32>
    %62 = vector.extract_strided_slice %60 {offsets = [0, 32], sizes = [8, 32], strides = [1, 1]} : vector<8x128xf32> to vector<8x32xf32>
    %63 = vector.extract_strided_slice %60 {offsets = [0, 64], sizes = [8, 32], strides = [1, 1]} : vector<8x128xf32> to vector<8x32xf32>
    %64 = vector.extract_strided_slice %60 {offsets = [0, 96], sizes = [8, 32], strides = [1, 1]} : vector<8x128xf32> to vector<8x32xf32>
    %65 = vector.extract_strided_slice %9 {offsets = [0, 0], sizes = [8, 32], strides = [1, 1]} : vector<8x128xf32> to vector<8x32xf32>
    %66 = arith.mulf %62, %65 : vector<8x32xf32>
    %67 = arith.mulf %61, %63 : vector<8x32xf32>
    %68 = arith.addf %66, %67 : vector<8x32xf32>
    %69 = math.tanh %68 : vector<8x32xf32>
    %70 = arith.mulf %64, %69 : vector<8x32xf32>
    %71 = vector.extract_strided_slice %13 {offsets = [0, 0], sizes = [32, 128], strides = [1, 1]} : vector<64x128xf32> to vector<32x128xf32>
    %cst_35 = arith.constant dense<0.000000e+00> : vector<8x128xf32>
    %72 = tpu.matmul %70, %71, %cst_35 {dimension_numbers = #tpu.dot_dimension_numbers<[1], [0], [0], [1], [0, 0, 1, 1], [], []>, precision = #tpu.contract_precision<fp32>} : vector<8x32xf32>, vector<32x128xf32>, vector<8x128xf32> -> vector<8x128xf32>
    %73 = arith.addf %72, %35 : vector<8x128xf32>
    %74 = math.tanh %73 : vector<8x128xf32>
    %cst_36 = arith.constant 5.000000e-01 : f32
    %75 = vector.broadcast %cst_36 : f32 to vector<8x128xf32>
    %76 = arith.mulf %75, %74 : vector<8x128xf32>
    %cst_37 = arith.constant 5.000000e-01 : f32
    %77 = vector.broadcast %cst_37 : f32 to vector<8x128xf32>
    %78 = arith.addf %76, %77 : vector<8x128xf32>
    %79 = arith.select %51, %74, %78 : vector<8x128xi1>, vector<8x128xf32>
    %80 = vector.extract_strided_slice %79 {offsets = [0, 0], sizes = [8, 32], strides = [1, 1]} : vector<8x128xf32> to vector<8x32xf32>
    %81 = vector.extract_strided_slice %79 {offsets = [0, 32], sizes = [8, 32], strides = [1, 1]} : vector<8x128xf32> to vector<8x32xf32>
    %82 = vector.extract_strided_slice %79 {offsets = [0, 64], sizes = [8, 32], strides = [1, 1]} : vector<8x128xf32> to vector<8x32xf32>
    %83 = vector.extract_strided_slice %79 {offsets = [0, 96], sizes = [8, 32], strides = [1, 1]} : vector<8x128xf32> to vector<8x32xf32>
    %84 = vector.extract_strided_slice %9 {offsets = [0, 32], sizes = [8, 32], strides = [1, 1]} : vector<8x128xf32> to vector<8x32xf32>
    %85 = arith.mulf %81, %84 : vector<8x32xf32>
    %86 = arith.mulf %80, %82 : vector<8x32xf32>
    %87 = arith.addf %85, %86 : vector<8x32xf32>
    %88 = math.tanh %87 : vector<8x32xf32>
    %89 = arith.mulf %83, %88 : vector<8x32xf32>
    %90 = vector.extract_strided_slice %15 {offsets = [0, 0], sizes = [32, 128], strides = [1, 1]} : vector<64x128xf32> to vector<32x128xf32>
    %cst_38 = arith.constant dense<0.000000e+00> : vector<8x128xf32>
    %91 = tpu.matmul %89, %90, %cst_38 {dimension_numbers = #tpu.dot_dimension_numbers<[1], [0], [0], [1], [0, 0, 1, 1], [], []>, precision = #tpu.contract_precision<fp32>} : vector<8x32xf32>, vector<32x128xf32>, vector<8x128xf32> -> vector<8x128xf32>
    %92 = arith.addf %91, %40 : vector<8x128xf32>
    %93 = math.tanh %92 : vector<8x128xf32>
    %cst_39 = arith.constant 5.000000e-01 : f32
    %94 = vector.broadcast %cst_39 : f32 to vector<8x128xf32>
    %95 = arith.mulf %94, %93 : vector<8x128xf32>
    %cst_40 = arith.constant 5.000000e-01 : f32
    %96 = vector.broadcast %cst_40 : f32 to vector<8x128xf32>
    %97 = arith.addf %95, %96 : vector<8x128xf32>
    %98 = arith.select %51, %93, %97 : vector<8x128xi1>, vector<8x128xf32>
    %99 = vector.extract_strided_slice %98 {offsets = [0, 0], sizes = [8, 32], strides = [1, 1]} : vector<8x128xf32> to vector<8x32xf32>
    %100 = vector.extract_strided_slice %98 {offsets = [0, 32], sizes = [8, 32], strides = [1, 1]} : vector<8x128xf32> to vector<8x32xf32>
    %101 = vector.extract_strided_slice %98 {offsets = [0, 64], sizes = [8, 32], strides = [1, 1]} : vector<8x128xf32> to vector<8x32xf32>
    %102 = vector.extract_strided_slice %98 {offsets = [0, 96], sizes = [8, 32], strides = [1, 1]} : vector<8x128xf32> to vector<8x32xf32>
    %103 = vector.extract_strided_slice %9 {offsets = [0, 64], sizes = [8, 32], strides = [1, 1]} : vector<8x128xf32> to vector<8x32xf32>
    %104 = arith.mulf %100, %103 : vector<8x32xf32>
    %105 = arith.mulf %99, %101 : vector<8x32xf32>
    %106 = arith.addf %104, %105 : vector<8x32xf32>
    %107 = math.tanh %106 : vector<8x32xf32>
    %108 = arith.mulf %102, %107 : vector<8x32xf32>
    %109 = vector.extract_strided_slice %17 {offsets = [0, 0], sizes = [32, 128], strides = [1, 1]} : vector<64x128xf32> to vector<32x128xf32>
    %cst_41 = arith.constant dense<0.000000e+00> : vector<8x128xf32>
    %110 = tpu.matmul %108, %109, %cst_41 {dimension_numbers = #tpu.dot_dimension_numbers<[1], [0], [0], [1], [0, 0, 1, 1], [], []>, precision = #tpu.contract_precision<fp32>} : vector<8x32xf32>, vector<32x128xf32>, vector<8x128xf32> -> vector<8x128xf32>
    %111 = arith.addf %110, %45 : vector<8x128xf32>
    %112 = math.tanh %111 : vector<8x128xf32>
    %cst_42 = arith.constant 5.000000e-01 : f32
    %113 = vector.broadcast %cst_42 : f32 to vector<8x128xf32>
    %114 = arith.mulf %113, %112 : vector<8x128xf32>
    %cst_43 = arith.constant 5.000000e-01 : f32
    %115 = vector.broadcast %cst_43 : f32 to vector<8x128xf32>
    %116 = arith.addf %114, %115 : vector<8x128xf32>
    %117 = arith.select %51, %112, %116 : vector<8x128xi1>, vector<8x128xf32>
    %118 = vector.extract_strided_slice %117 {offsets = [0, 0], sizes = [8, 32], strides = [1, 1]} : vector<8x128xf32> to vector<8x32xf32>
    %119 = vector.extract_strided_slice %117 {offsets = [0, 32], sizes = [8, 32], strides = [1, 1]} : vector<8x128xf32> to vector<8x32xf32>
    %120 = vector.extract_strided_slice %117 {offsets = [0, 64], sizes = [8, 32], strides = [1, 1]} : vector<8x128xf32> to vector<8x32xf32>
    %121 = vector.extract_strided_slice %117 {offsets = [0, 96], sizes = [8, 32], strides = [1, 1]} : vector<8x128xf32> to vector<8x32xf32>
    %122 = vector.extract_strided_slice %9 {offsets = [0, 96], sizes = [8, 32], strides = [1, 1]} : vector<8x128xf32> to vector<8x32xf32>
    %123 = arith.mulf %119, %122 : vector<8x32xf32>
    %124 = arith.mulf %118, %120 : vector<8x32xf32>
    %125 = arith.addf %123, %124 : vector<8x32xf32>
    %126 = math.tanh %125 : vector<8x32xf32>
    %127 = arith.mulf %121, %126 : vector<8x32xf32>
    %128 = tpu.concatenate %70, %89, %108, %127 in 1 : vector<8x32xf32>, vector<8x32xf32>, vector<8x32xf32>, vector<8x32xf32> -> vector<8x128xf32>
    %c0_44 = arith.constant 0 : index
    %c0_45 = arith.constant 0 : index
    %129 = vector.load %arg9[%c0_44, %c0_45] : memref<8x128xf32, #tpu.memory_space<vmem>>, vector<8x128xf32>
    tpu.vector_store %arg9[%c0_44, %c0_45], %128 {strides = array<i32>} : memref<8x128xf32, #tpu.memory_space<vmem>>, vector<8x128xf32>,
    %130 = tpu.concatenate %68, %87, %106, %125 in 1 : vector<8x32xf32>, vector<8x32xf32>, vector<8x32xf32>, vector<8x32xf32> -> vector<8x128xf32>
    %c0_46 = arith.constant 0 : index
    %c0_47 = arith.constant 0 : index
    %131 = vector.load %arg10[%c0_46, %c0_47] : memref<8x128xf32, #tpu.memory_space<vmem>>, vector<8x128xf32>
    tpu.vector_store %arg10[%c0_46, %c0_47], %130 {strides = array<i32>} : memref<8x128xf32, #tpu.memory_space<vmem>>, vector<8x128xf32>,
    %c0_48 = arith.constant 0 : index
    %c0_49 = arith.constant 0 : index
    %132 = vector.load %arg6[%c0_48, %c0_49] : memref<32x256xf32, #tpu.memory_space<vmem>>, vector<32x256xf32>
    %cst_50 = arith.constant dense<0.000000e+00> : vector<8x256xf32>
    %133 = tpu.matmul %127, %132, %cst_50 {dimension_numbers = #tpu.dot_dimension_numbers<[1], [0], [0], [1], [0, 0, 1, 1], [], []>, precision = #tpu.contract_precision<fp32>} : vector<8x32xf32>, vector<32x256xf32>, vector<8x256xf32> -> vector<8x256xf32>
    %c0_51 = arith.constant 0 : index
    %c0_52 = arith.constant 0 : index
    %134 = vector.load %arg7[%c0_51, %c0_52] : memref<1x256xf32, #tpu.memory_space<vmem>>, vector<1x256xf32>
    %135 = vector.broadcast %134 : vector<1x256xf32> to vector<8x256xf32>
    %136 = arith.addf %133, %135 : vector<8x256xf32>
    %c0_53 = arith.constant 0 : index
    %c0_54 = arith.constant 0 : index
    %137 = vector.load %arg8[%c0_53, %c0_54] : memref<8x256xf32, #tpu.memory_space<vmem>>, vector<8x256xf32>
    tpu.vector_store %arg8[%c0_53, %c0_54], %136 {strides = array<i32>} : memref<8x256xf32, #tpu.memory_space<vmem>>, vector<8x256xf32>,
    return
  }
}

</mosaic_0001>

<bundles_post_ra>
// kernel: _lambda_.1
= control target key start
LH: loop header
LB: loop body
LE: loop exit
PB: predicated region body
PF: predicated region fallthrough
CT: control target
= control target key end

     0   :  { %16 = vsyncpa [#allocation3], 0  ;;  %s8415_s0 = inlined_call_operand.vmem [shape: s32[8,1], index: 0, kind: input, shape index: {}]   ;;  %s8416_s1 = inlined_call_operand.hbm [shape: f32[256,32], index: 1, kind: input, shape index: {}]   ;;  %s8417_s2 = inlined_call_operand.vmem [shape: f32[8,128], index: 2, kind: input, shape index: {}]   ;;  %s8418_s3 = inlined_call_operand.vmem [shape: f32[8,128], index: 3, kind: input, shape index: {}]   ;;  %s8419_s4 = inlined_call_operand.hbm [shape: f32[4,64,128], index: 4, kind: input, shape index: {}]   ;;  %s8420_s5 = inlined_call_operand.vmem [shape: f32[4,1,128], index: 5, kind: input, shape index: {}]   ;;  %s8421_s6 = inlined_call_operand.vmem [shape: f32[32,256], index: 6, kind: input, shape index: {}]   ;;  %s8422_s7 = inlined_call_operand.vmem [shape: f32[1,256], index: 7, kind: input, shape index: {}]   ;;  %s8423_s8 = inlined_call_operand.hbm [shape: f32[8,256], index: 8, kind: output, shape index: {0}]   ;;  %s8424_s9 = inlined_call_operand.vmem [shape: f32[8,128], index: 9, kind: output, shape index: {1}]   ;;  %s8425_s10 = inlined_call_operand.vmem [shape: f32[8,128], index: 10, kind: output, shape index: {2}]  }
   0x1   :  { %17 = vsyncpa [#allocation6], 0 }
   0x2   :  { %18 = vsyncpa [#allocation4], 0  ;;  %s6758_s13 = smov [#allocation2]  }
   0x3   :  { %s26_s14 = sshll.u32 %s6758_s13, 4  ;;  %s27_s14 = int_to_ptr.vmem [resolvable:$true] %s26_s14 }
   0x4   :  { %s6700_s15 = scalar_lea.vmem %s27_s14, 4096  ;;  %p6705_p1 = scmp.lt.s32.totalorder %s27_s14, %s27_s14 }
   0x5   :  { %p6701_p0 = scmp.ne.s32.totalorder %s27_s14, %s6700_s15  ;;  %p6706_p2 = scmp.lt.s32.totalorder %s6700_s15, %s6700_s15 }
   0x7   :  { %p6707_p3 = por %p6706_p2, %p6705_p1 }
   0x9   :  { %p6708_p4 = pnand %p6707_p3, %p6701_p0 }
   0xb   :  { %6711 = shalt.err (!%p6708_p4)
}
   0xc   :  { %s6759_s16 = smov 128   ;;  %s6760_s17 = smov 8  }
   0xd   :  { %32 = dma.hbm_to_vmem [thread:$0]  %s8416_s1, 4096, %s27_s14, [#allocation3], %s6759_s16, %s6759_s16, %s6760_s17  }
   0xe   :  { %s6761_s20 = smov [#allocation5]  }
   0xf   :  { %s42_s21 = sshll.u32 %s6761_s20, 4  ;;  %s43_s21 = int_to_ptr.vmem [resolvable:$true] %s42_s21 }
  0x10   :  { %s6720_s22 = scalar_lea.vmem %s43_s21, 4096  ;;  %p6725_p6 = scmp.lt.s32.totalorder %s43_s21, %s43_s21 }
  0x11   :  { %p6721_p5 = scmp.ne.s32.totalorder %s43_s21, %s6720_s22  ;;  %p6726_p7 = scmp.lt.s32.totalorder %s6720_s22, %s6720_s22 }
  0x13   :  { %p6727_p8 = por %p6726_p7, %p6725_p6 }
  0x15   :  { %p6728_p9 = pnand %p6727_p8, %p6721_p5 }
  0x17   :  { %6731 = shalt.err (!%p6728_p9)
}
  0x18   :  { %48 = dma.hbm_to_vmem [thread:$0]  %s8419_s4, 4096, %s43_s21, [#allocation6], %s6759_s16, %s6759_s16, %s6760_s17  }
  0x19   :  { %6752 = dma.done.wait [#allocation3], 4096  }
  0x1a   :  { %6753 = vsyncadd [#allocation3], 4294963200 }
  0x1b   :  { %6754 = dma.done.wait [#allocation6], 4096  }
  0x1c   :  { %6755 = vsyncadd [#allocation6], 4294963200  ;;  %v6762_v0 = vmov 0   ;;  %v61_v1 = vld [vmem:[%s8415_s0] sm:$0xff]  ;;  %v105_v2 = vld [vmem:[#allocation2 + $0xf8] sm:$0xff]  ;;  %s6763_s26 = smov 96  }
  0x1d   :  { %6675 = vset.pattern.permute.xlu0 %v6762_v0  ;;  %v89_v3 = vld [vmem:[#allocation2 + $0x78] sm:$0xff]  ;;  %v6834_v4 = vand.u32 4294901760, %v105_v2  ;;  %v104_v6 = vld [vmem:[#allocation2 + $0xf0] sm:$0xff]  ;;  %v103_v8 = vld [vmem:[#allocation2 + $0xe8] sm:$0xff]  ;;  %s6764_s27 = smov 64   ;;  %s6765_s28 = smov 32  }
  0x1e   :  { %66 = vperm.xlu0 %6675, %v61_v1   ;;  %v6836_v5 = vand.u32 4294901760, %v89_v3  ;;  %v88_v7 = vld [vmem:[#allocation2 + $0x70] sm:$0xff]  ;;  %v6838_v9 = vand.u32 4294901760, %v104_v6  ;;  %v6842_v11 = vand.u32 4294901760, %v103_v8  ;;  %v87_v12 = vld [vmem:[#allocation2 + $0x68] sm:$0xff]  ;;  %v102_v13 = vld [vmem:[#allocation2 + $0xe0] sm:$0xff] }
  0x1f   :  { %v6840_v10 = vand.u32 4294901760, %v88_v7  ;;  %v86_v14 = vld [vmem:[#allocation2 + $0x60] sm:$0xff]  ;;  %v6845_v15 = vsub.f32 %v105_v2, %v6834_v4  ;;  %v6850_v17 = vand.u32 4294901760, %v87_v12  ;;  %v6852_v18 = vand.u32 4294901760, %v102_v13  ;;  %5685 = vmatprep.subr.mxu0 %v6834_v4  ;;  %v101_v39 = vld [vmem:[#allocation2 + $0xd8] sm:$0xff]  ;;  %v100_v45 = vld [vmem:[#allocation2 + $0xd0] sm:$0xff] }
  0x20   :  { %v6848_v16 = vsub.f32 %v89_v3, %v6836_v5  ;;  %v6856_v19 = vsub.f32 %v104_v6, %v6838_v9  ;;  %v6862_v21 = vsub.f32 %v103_v8, %v6842_v11  ;;  %v6864_v22 = vand.u32 4294901760, %v86_v14  ;;  %5686 = vmatpush3.msra.mxu0 %v6836_v5  ;;  %v85_v40 = vld [vmem:[#allocation2 + $0x58] sm:$0xff]  ;;  %v84_v46 = vld [vmem:[#allocation2 + $0x50] sm:$0xff]  ;;  %v99_v47 = vld [vmem:[#allocation2 + $0xc8] sm:$0xff] }
  0x21   :  { %v6859_v20 = vsub.f32 %v88_v7, %v6840_v10  ;;  %v8445_v23 = vand.u32 4294901760, %v6845_v15  ;;  %v6870_v25 = vsub.f32 %v87_v12, %v6850_v17  ;;  %v6873_v26 = vsub.f32 %v102_v13, %v6852_v18  ;;  %5687 = vmatprep.subr.mxu0 %v6838_v9  ;;  %v83_v52 = vld [vmem:[#allocation2 + $0x48] sm:$0xff]  ;;  %v98_v53 = vld [vmem:[#allocation2 + $0xc0] sm:$0xff] }
  0x22   :  { %v8442_v24 = vand.u32 4294901760, %v6848_v16  ;;  %v8441_v27 = vand.u32 4294901760, %v6856_v19  ;;  %v8437_v29 = vand.u32 4294901760, %v6862_v21  ;;  %v6880_v30 = vsub.f32 %v86_v14, %v6864_v22  ;;  %5688 = vmatpush3.msra.mxu0 %v6840_v10  ;;  %v82_v58 = vld [vmem:[#allocation2 + $0x40] sm:$0xff] }
  0x23   :  { %v8440_v28 = vand.u32 4294901760, %v6859_v20  ;;  %v334_v31 = vsub.f32 %v6845_v15, %v8445_v23  ;;  %v8436_v33 = vand.u32 4294901760, %v6870_v25  ;;  %v8435_v34 = vand.u32 4294901760, %v6873_v26  ;;  %5689 = vmatprep.subr.mxu0 %v6842_v11  ;;  %v92_v23 = vld [vmem:[#allocation2 + $0x90] sm:$0xff] }
  0x24   :  { %v222_v32 = vsub.f32 %v6848_v16, %v8442_v24  ;;  %v341_v35 = vsub.f32 %v6856_v19, %v8441_v27  ;;  %v348_v37 = vsub.f32 %v6862_v21, %v8437_v29  ;;  %v8433_v38 = vand.u32 4294901760, %v6880_v30  ;;  %5690 = vmatpush3.msra.mxu0 %v6850_v17  ;;  %v77_v27 = vld [vmem:[#allocation2 + $0x18] sm:$0xff] }
  0x25   :  { %v229_v36 = vsub.f32 %v6859_v20, %v8440_v28  ;;  %v335_v41 = vand.u32 4294901760, %v334_v31  ;;  %v236_v43 = vsub.f32 %v6870_v25, %v8436_v33  ;;  %v355_v44 = vsub.f32 %v6873_v26, %v8435_v34  ;;  %5691 = vmatprep.subr.mxu0 %v6852_v18  ;;  %v93_v28 = vld [vmem:[#allocation2 + $0x98] sm:$0xff] }
  0x26   :  { %v223_v42 = vand.u32 4294901760, %v222_v32  ;;  %v342_v48 = vand.u32 4294901760, %v341_v35  ;;  %v349_v50 = vand.u32 4294901760, %v348_v37  ;;  %v243_v51 = vsub.f32 %v6880_v30, %v8433_v38  ;;  %5692 = vmatpush3.msra.mxu0 %v6864_v22 }
  0x27   :  { %v230_v49 = vand.u32 4294901760, %v229_v36  ;;  %5720 = vmatprep.subr.mxu1 %v335_v41  ;;  %v237_v54 = vand.u32 4294901760, %v236_v43  ;;  %v356_v55 = vand.u32 4294901760, %v355_v44  ;;  %v6914_v56 = vand.u32 4294901760, %v101_v39 }
  0x28   :  { %v6916_v57 = vand.u32 4294901760, %v85_v40  ;;  %5721 = vmatpush3.msra.mxu1 %v223_v42  ;;  %v244_v59 = vand.u32 4294901760, %v243_v51  ;;  %v6918_v60 = vand.u32 4294901760, %v100_v45  ;;  %v6920_v61 = vand.u32 4294901760, %v84_v46 }
  0x29   :  { %v6922_v62 = vand.u32 4294901760, %v99_v47  ;;  %5722 = vmatprep.subr.mxu1 %v342_v48  ;;  %v6925_v63 = vsub.f32 %v101_v39, %v6914_v56  ;;  %v6930_v1 = vand.u32 4294901760, %v83_v52  ;;  %v6932_v2 = vand.u32 4294901760, %v98_v53  ;;  %5693 = vmatprep.subr.mxu0 %v6914_v56  ;;  %v81_v48 = vld [vmem:[#allocation2 + $0x38] sm:$0xff] }
  0x2a   :  { %v6928_v0 = vsub.f32 %v85_v40, %v6916_v57  ;;  %5723 = vmatpush3.msra.mxu1 %v230_v49  ;;  %v6936_v3 = vsub.f32 %v100_v45, %v6918_v60  ;;  %v6939_v6 = vsub.f32 %v84_v46, %v6920_v61  ;;  %v6944_v8 = vand.u32 4294901760, %v82_v58  ;;  %5694 = vmatpush3.msra.mxu0 %v6916_v57 }
  0x2b   :  { %v6942_v7 = vsub.f32 %v99_v47, %v6922_v62  ;;  %5724 = vmatprep.subr.mxu1 %v349_v50  ;;  %v8432_v12 = vand.u32 4294901760, %v6925_v63  ;;  %v6950_v14 = vsub.f32 %v83_v52, %v6930_v1  ;;  %v6953_v31 = vsub.f32 %v98_v53, %v6932_v2  ;;  %5695 = vmatprep.subr.mxu0 %v6918_v60  ;;  %v97_v47 = vld [vmem:[#allocation2 + $0xb8] sm:$0xff]  ;;  %v96_v53 = vld [vmem:[#allocation2 + $0xb0] sm:$0xff] }
  0x2c   :  { %v8431_v13 = vand.u32 4294901760, %v6928_v0  ;;  %5725 = vmatpush3.msra.mxu1 %v237_v54  ;;  %v8429_v32 = vand.u32 4294901760, %v6936_v3  ;;  %v8427_v35 = vand.u32 4294901760, %v6939_v6  ;;  %v6960_v37 = vsub.f32 %v82_v58, %v6944_v8  ;;  %5696 = vmatpush3.msra.mxu0 %v6920_v61  ;;  %v80_v54 = vld [vmem:[#allocation2 + $0x30] sm:$0xff] }
  0x2d   :  { %8491 = vst [vmem:[#allocation11_spill] sm:$0xff] %v6953_v31  ;;  %v8426_v36 = vand.u32 4294901760, %v6942_v7  ;;  %5726 = vmatprep.subr.mxu1 %v356_v55  ;;  %v362_v39 = vsub.f32 %v6925_v63, %v8432_v12  ;;  %v8428_v41 = vand.u32 4294901760, %v6950_v14  ;;  %v8430_v42 = vand.u32 4294901760, %v6953_v31  ;;  %5697 = vmatprep.subr.mxu0 %v6922_v62  ;;  %v95_v55 = vld [vmem:[#allocation2 + $0xa8] sm:$0xff]  ;;  %v78_v12 = vld [vmem:[#allocation2 + $0x20] sm:$0xff] }
  0x2e   :  { %8492 = vst [vmem:[#allocation12_spill] sm:$0xff] %v6960_v37  ;;  %v250_v40 = vsub.f32 %v6928_v0, %v8431_v13  ;;  %5727 = vmatpush3.msra.mxu1 %v244_v59  ;;  %v369_v43 = vsub.f32 %v6936_v3, %v8429_v32  ;;  %v257_v44 = vsub.f32 %v6939_v6, %v8427_v35  ;;  %v8434_v46 = vand.u32 4294901760, %v6960_v37  ;;  %v94_v35 = vld [vmem:[#allocation2 + $0xa0] sm:$0xff] }
  0x2f   :  { %v376_v45 = vsub.f32 %v6942_v7, %v8426_v36  ;;  %5698 = vmatpush3.msra.mxu0 %v6930_v1  ;;  %v363_v49 = vand.u32 4294901760, %v362_v39  ;;  %v264_v51 = vsub.f32 %v6950_v14, %v8428_v41  ;;  %v383_v52 = vsub.f32 %v6953_v31, %v8430_v42 }
  0x30   :  { %v251_v50 = vand.u32 4294901760, %v250_v40  ;;  %5699 = vmatprep.subr.mxu0 %v6932_v2  ;;  %v370_v58 = vand.u32 4294901760, %v369_v43  ;;  %v258_v59 = vand.u32 4294901760, %v257_v44  ;;  %v271_v39 = vsub.f32 %v6960_v37, %v8434_v46  ;;  %v79_v40 = vld [vmem:[#allocation2 + $0x28] sm:$0xff]  ;;  %v74_v37 = vld [vmem:[#allocation2] sm:$0xff] }
  0x31   :  { %v377_v36 = vand.u32 4294901760, %v376_v45  ;;  %5700 = vmatpush3.msra.mxu0 %v6944_v8  ;;  %5728 = vmatprep.subr.mxu1 %v363_v49  ;;  %v265_v41 = vand.u32 4294901760, %v264_v51  ;;  %v384_v32 = vand.u32 4294901760, %v383_v52  ;;  %v6994_v42 = vand.u32 4294901760, %v97_v47 }
  0x32   :  { %v6996_v13 = vand.u32 4294901760, %v81_v48  ;;  %5729 = vmatpush3.msra.mxu1 %v251_v50  ;;  %v272_v43 = vand.u32 4294901760, %v271_v39  ;;  %v6998_v44 = vand.u32 4294901760, %v96_v53  ;;  %v7000_v45 = vand.u32 4294901760, %v80_v54 }
  0x33   :  { %v7002_v38 = vand.u32 4294901760, %v95_v55  ;;  %5730 = vmatprep.subr.mxu1 %v370_v58  ;;  %v7005_v46 = vsub.f32 %v97_v47, %v6994_v42  ;;  %v7010_v51 = vand.u32 4294901760, %v79_v40  ;;  %v7012_v52 = vand.u32 4294901760, %v94_v35  ;;  %5701 = vmatprep.subr.mxu0 %v6994_v42 }
  0x34   :  { %v7008_v49 = vsub.f32 %v81_v48, %v6996_v13  ;;  %5731 = vmatpush3.msra.mxu1 %v258_v59  ;;  %v7016_v50 = vsub.f32 %v96_v53, %v6998_v44  ;;  %v7019_v39 = vsub.f32 %v80_v54, %v7000_v45  ;;  %v7024_v47 = vand.u32 4294901760, %v78_v12  ;;  %5702 = vmatpush3.msra.mxu0 %v6996_v13 }
  0x35   :  { %8493 = vst [vmem:[#allocation13_spill] sm:$0xff] %v7005_v46  ;;  %v7022_v58 = vsub.f32 %v95_v55, %v7002_v38  ;;  %5732 = vmatprep.subr.mxu1 %v377_v36  ;;  %v8438_v48 = vand.u32 4294901760, %v7005_v46  ;;  %v7030_v59 = vsub.f32 %v79_v40, %v7010_v51  ;;  %v7033_v53 = vsub.f32 %v94_v35, %v7012_v52 }
  0x36   :  { %8494 = vst [vmem:[#allocation14_spill] sm:$0xff] %v7008_v49  ;;  %8495 = vst [vmem:[#allocation15_spill] sm:$0xff] %v7016_v50  ;;  %v8439_v34 = vand.u32 4294901760, %v7008_v49  ;;  %5703 = vmatprep.subr.mxu0 %v6998_v44  ;;  %5733 = vmatpush3.msra.mxu1 %v265_v41  ;;  %v8443_v54 = vand.u32 4294901760, %v7016_v50  ;;  %v8444_v55 = vand.u32 4294901760, %v7019_v39  ;;  %v7040_v36 = vsub.f32 %v78_v12, %v7024_v47 }
  0x37   :  { %8496 = vst [vmem:[#allocation16_spill] sm:$0xff] %v7019_v39  ;;  %8497 = vst [vmem:[#allocation17_spill] sm:$0xff] %v7022_v58  ;;  %v8450_v33 = vand.u32 4294901760, %v7022_v58  ;;  %5704 = vmatpush3.msra.mxu0 %v7000_v45  ;;  %5734 = vmatprep.subr.mxu1 %v384_v32  ;;  %v390_v35 = vsub.f32 %v7005_v46, %v8438_v48  ;;  %v8457_v40 = vand.u32 4294901760, %v7030_v59  ;;  %v8460_v29 = vand.u32 4294901760, %v7033_v53  ;;  %v90_v46 = vld [vmem:[#allocation2 + $0x80] sm:$0xff] }
  0x38   :  { %8498 = vst [vmem:[#allocation18_spill] sm:$0xff] %v7030_v59  ;;  %8499 = vst [vmem:[#allocation19_spill] sm:$0xff] %v7033_v53  ;;  %v278_v41 = vsub.f32 %v7008_v49, %v8439_v34  ;;  %5705 = vmatprep.subr.mxu0 %v7002_v38  ;;  %5735 = vmatpush3.msra.mxu1 %v272_v43  ;;  %v397_v12 = vsub.f32 %v7016_v50, %v8443_v54  ;;  %v91_v50 = vld [vmem:[#allocation2 + $0x88] sm:$0xff]  ;;  %v8501_v49 = vand.u32 4294901760, %v7040_v36  ;;  %vm1018_vm2 = vcmask 261120  }
  0x39   :  { %8500 = vst [vmem:[#allocation20_spill] sm:$0xff] %v7040_v36  ;;  %v285_v32 = vsub.f32 %v7019_v39, %v8444_v55  ;;  %v404_v48 = vsub.f32 %v7022_v58, %v8450_v33  ;;  %5706 = vmatpush3.msra.mxu0 %v7010_v51  ;;  %v391_v24 = vand.u32 4294901760, %v390_v35  ;;  %v292_v54 = vsub.f32 %v7030_v59, %v8457_v40  ;;  %v76_v39 = vld [vmem:[#allocation2 + $0x10] sm:$0xff] }
  0x3a   :  { %v279_v43 = vand.u32 4294901760, %v278_v41  ;;  %v411_v55 = vsub.f32 %v7033_v53, %v8460_v29  ;;  %5707 = vmatprep.subr.mxu0 %v7012_v52  ;;  %v398_v33 = vand.u32 4294901760, %v397_v12  ;;  %v299_v35 = vsub.f32 %v7040_v36, %v8501_v49  ;;  %v75_v41 = vld [vmem:[#allocation2 + $0x8] sm:$0xff] }
  0x3b   :  { %v286_v34 = vand.u32 4294901760, %v285_v32  ;;  %v405_v58 = vand.u32 4294901760, %v404_v48  ;;  %5708 = vmatpush3.msra.mxu0 %v7024_v47  ;;  %5736 = vmatprep.subr.mxu1 %v391_v24  ;;  %v293_v40 = vand.u32 4294901760, %v292_v54  ;;  %v7074_v29 = vand.u32 4294901760, %v93_v28 }
  0x3c   :  { %v412_v59 = vand.u32 4294901760, %v411_v55  ;;  %v7076_v53 = vand.u32 4294901760, %v77_v27  ;;  %5737 = vmatpush3.msra.mxu1 %v279_v43  ;;  %v300_v12 = vand.u32 4294901760, %v299_v35  ;;  %v7078_v32 = vand.u32 4294901760, %v92_v23 }
  0x3d   :  { %v7080_v48 = vand.u32 4294901760, %v76_v39  ;;  %v7082_v31 = vand.u32 4294901760, %v91_v50  ;;  %5738 = vmatprep.subr.mxu1 %v398_v33  ;;  %v7085_v49 = vsub.f32 %v93_v28, %v7074_v29  ;;  %v7090_v54 = vand.u32 4294901760, %v75_v41  ;;  %5709 = vmatprep.subr.mxu0 %v7074_v29 }
  0x3e   :  { %8502 = vst [vmem:[#allocation21_spill] sm:$0xff] %v7076_v53  ;;  %8503 = vst [vmem:[#allocation22_spill] sm:$0xff] %v7078_v32  ;;  %v7088_v24 = vsub.f32 %v77_v27, %v7076_v53  ;;  %v7092_v55 = vand.u32 4294901760, %v90_v46  ;;  %5739 = vmatpush3.msra.mxu1 %v286_v34  ;;  %v7096_v43 = vsub.f32 %v92_v23, %v7078_v32  ;;  %v7104_v28 = vand.u32 4294901760, %v74_v37 }
  0x3f   :  { %8504 = vst [vmem:[#allocation23_spill] sm:$0xff] %v7085_v49  ;;  %v7099_v35 = vsub.f32 %v76_v39, %v7080_v48  ;;  %v7102_v33 = vsub.f32 %v91_v50, %v7082_v31  ;;  %5710 = vmatpush3.msra.mxu0 %v7076_v53  ;;  %5740 = vmatprep.subr.mxu1 %v405_v58  ;;  %v8471_v27 = vand.u32 4294901760, %v7085_v49  ;;  %vm6768_vm3 = vmmov 0  }
  0x40   :  { %8505 = vst [vmem:[#allocation24_spill] sm:$0xff] %v7088_v24  ;;  %8506 = vst [vmem:[#allocation25_spill] sm:$0xff] %v7096_v43  ;;  %v8474_v36 = vand.u32 4294901760, %v7088_v24  ;;  %v7110_v34 = vsub.f32 %v75_v41, %v7090_v54  ;;  %v7113_v23 = vsub.f32 %v90_v46, %v7092_v55  ;;  %5711 = vmatprep.subr.mxu0 %v7078_v32  ;;  %5741 = vmatpush3.msra.mxu1 %v293_v40  ;;  %vm5055_vm7 = vcmask 523264  }
  0x41   :  { %8507 = vst [vmem:[#allocation26_spill] sm:$0xff] %v7099_v35  ;;  %v8477_v50 = vand.u32 4294901760, %v7096_v43  ;;  %v7120_v58 = vsub.f32 %v74_v37, %v7104_v28  ;;  %5712 = vmatpush3.msra.mxu0 %v7080_v48  ;;  %5742 = vmatprep.subr.mxu1 %v412_v59  ;;  %v418_v46 = vsub.f32 %v7085_v49, %v8471_v27  ;;  %v8508_v59 = vand.u32 4294901760, %v7099_v35 }
  0x42   :  { %v306_v40 = vsub.f32 %v7088_v24, %v8474_v36  ;;  %5713 = vmatprep.subr.mxu0 %v7082_v31  ;;  %5743 = vmatpush3.msra.mxu1 %v300_v12  ;;  %v8509_v27 = vand.u32 4294901760, %v7102_v33  ;;  %v8510_v12 = vand.u32 4294901760, %v7110_v34  ;;  %vm5057_vm8 = vcmask 785408  }
  0x43   :  { %v425_v37 = vsub.f32 %v7096_v43, %v8477_v50  ;;  %v313_v53 = vsub.f32 %v7099_v35, %v8508_v59  ;;  %v8483_v36 = vand.u32 4294901760, %v7120_v58  ;;  %5714 = vmatpush3.msra.mxu0 %v7090_v54  ;;  %v419_v39 = vand.u32 4294901760, %v418_v46 }
  0x44   :  { %v432_v49 = vsub.f32 %v7102_v33, %v8509_v27  ;;  %v307_v41 = vand.u32 4294901760, %v306_v40  ;;  %v320_v24 = vsub.f32 %v7110_v34, %v8510_v12  ;;  %v8511_v50 = vand.u32 4294901760, %v7113_v23  ;;  %5715 = vmatprep.subr.mxu0 %v7092_v55 }
  0x45   :  { %v426_v59 = vand.u32 4294901760, %v425_v37  ;;  %v314_v35 = vand.u32 4294901760, %v313_v53  ;;  %v327_v27 = vsub.f32 %v7120_v58, %v8483_v36  ;;  %5716 = vmatpush3.msra.mxu0 %v7104_v28  ;;  %5744 = vmatprep.subr.mxu1 %v419_v39  ;;  %v7159_v53 = vld [vmem:[%s8417_s2] sm:$0xff]  ;;  %v8484_v39 = vmov 0.0   ;;  %v8519_v36 = vld [vmem:[#allocation16_spill] sm:$0xff] }
  0x46   :  { %v439_v43 = vsub.f32 %v7113_v23, %v8511_v50  ;;  %v433_v46 = vand.u32 4294901760, %v432_v49  ;;  %5755 = vmatprep.subr.mxu0 %v6845_v15  ;;  %5745 = vmatpush3.msra.mxu1 %v307_v41  ;;  %v321_v40 = vand.u32 4294901760, %v320_v24  ;;  %v8482_v49 = vlaneseq }
  0x47   :  { %5746 = vmatprep.subr.mxu1 %v426_v59  ;;  %v328_v50 = vand.u32 4294901760, %v327_v27  ;;  %1513 = vrot.lane.b32.xlu0 %v7159_v53, %s6763_s26  ;;  %v8486_v59 = vmov 1.0  }
  0x48   :  { %v440_v12 = vand.u32 4294901760, %v439_v43  ;;  %5747 = vmatpush3.msra.mxu1 %v314_v35  ;;  %2008 = vrot.lane.b32.xlu1 %v7159_v53, %s6764_s27  ;;  %v7168_v24 = vand.u32 127, %v8482_v49 }
  0x49   :  { %5748 = vmatprep.subr.mxu1 %v433_v46 }
  0x4a   :  { %5749 = vmatpush3.msra.mxu1 %v321_v40  ;;  %8512 = vst [vmem:[#allocation27_spill] sm:$0xff] %v7168_v24  ;;  %v7171_v43 = vadd.s32 128, %v7168_v24 }
  0x4b   :  { %5750 = vmatprep.subr.mxu1 %v440_v12 }
  0x4c   :  { %5751 = vmatpush3.msra.mxu1 %v328_v50  ;;  %2503 = vrot.lane.b32.xlu1 %v7159_v53, %s6765_s28 }
  0x4d   :  { %5790 = vmatprep.subr.mxu1 %v6834_v4 }
  0x99   :  { %v7173_v35 = vpop.permute.xlu0 %66 }
  0x9a   :  { %vm68_vm0 = vcmp.eq.s32.totalorder %v7168_v24, %v7173_v35  ;;  %vm69_vm1 = vcmp.eq.s32.totalorder %v7171_v43, %v7173_v35  ;;  %v8522_v24 = vld [vmem:[#allocation19_spill] sm:$0xff] }
  0x9b   :  { %v5670_v41 = vsel %vm68_vm0, 1.0, %v8484_v39  ;;  %v5671_v37 = vsel %vm69_vm1, 1.0, %v8484_v39  ;;  %5672 = vmatprep.mubr.msk.f32.mxu1 %vm69_vm1, %v8486_v59  ;;  %v8520_v39 = vld [vmem:[#allocation17_spill] sm:$0xff] }
  0x9c   :  { %v203_v27 = vsub.f32 %v5671_v37, %v5671_v37  ;;  %v7191_v46 = vsub.f32 %v5670_v41, %v5670_v41  ;;  %5673 = vmatmul.mubr.msk.f32.vlgmr.msra.gmra.mxu1 %vm68_vm0, %v8486_v59  ;;  %v8521_v59 = vld [vmem:[#allocation18_spill] sm:$0xff] }
  0x9d   :  { %5791 = vmatpush3.msra.mxu1 %v6836_v5 }
  0x9e   :  { %5792 = vmatprep.subr.mxu1 %v6838_v9  ;;  %v204_v40 = vand.u32 4294901760, %v203_v27  ;;  %v210_v12 = vand.u32 4294901760, %v7191_v46 }
  0x9f   :  { %5793 = vmatpush3.msra.mxu1 %v6840_v10 }
  0xa0   :  { %5794 = vmatprep.subr.mxu1 %v6842_v11  ;;  %687 = vmatprep.mubr.f32.mxu1 %v204_v40  ;;  %v205_v50 = vsub.f32 %v203_v27, %v204_v40  ;;  %v211_v41 = vsub.f32 %v7191_v46, %v210_v12  ;;  %v8515_v40 = vld [vmem:[#allocation13_spill] sm:$0xff] }
  0xa1   :  { %5795 = vmatpush3.msra.mxu1 %v6850_v17 }
  0xa2   :  { %5796 = vmatprep.subr.mxu1 %v6852_v18  ;;  %v206_v37 = vand.u32 4294901760, %v205_v50  ;;  %v212_v49 = vand.u32 4294901760, %v211_v41  ;;  %v8516_v50 = vld [vmem:[#allocation21_spill] sm:$0xff]  ;;  %v8517_v41 = vld [vmem:[#allocation14_spill] sm:$0xff] }
  0xa3   :  { %5797 = vmatpush3.msra.mxu1 %v6864_v22 }
  0xa4   :  { %5798 = vmatprep.subr.mxu1 %v6914_v56  ;;  %207 = vmatprep.mubr.f32.mxu0 %v206_v37  ;;  %v8518_v37 = vld [vmem:[#allocation15_spill] sm:$0xff] }
  0xa5   :  { %5799 = vmatpush3.msra.mxu1 %v6916_v57  ;;  %213 = vmatmul.mubr.f32.vlgmr.msra.gmra.mxu0 %v212_v49  ;;  %v8513_v49 = vld [vmem:[#allocation11_spill] sm:$0xff] }
  0xa6   :  { %5756 = vmatpush3.msra.mxu0 %v6848_v16  ;;  %5800 = vmatprep.subr.mxu1 %v6918_v60 }
  0xa7   :  { %5757 = vmatprep.subr.mxu0 %v6856_v19  ;;  %580 = vmatprep.mubr.f32.mxu0 %v203_v27  ;;  %v8514_v27 = vld [vmem:[#allocation12_spill] sm:$0xff] }
  0xa8   :  { %5801 = vmatpush3.msra.mxu1 %v6920_v61  ;;  %5758 = vmatpush3.msra.mxu0 %v6859_v20 }
  0xa9   :  { %5802 = vmatprep.subr.mxu1 %v6922_v62  ;;  %5759 = vmatprep.subr.mxu0 %v6862_v21 }
  0xaa   :  { %5803 = vmatpush3.msra.mxu1 %v6930_v1  ;;  %5760 = vmatpush3.msra.mxu0 %v6870_v25 }
  0xab   :  { %5804 = vmatprep.subr.mxu1 %v6932_v2  ;;  %5761 = vmatprep.subr.mxu0 %v6873_v26 }
  0xac   :  { %5805 = vmatpush3.msra.mxu1 %v6944_v8  ;;  %5762 = vmatpush3.msra.mxu0 %v6880_v30 }
  0xad   :  { %5806 = vmatprep.subr.mxu1 %v6994_v42  ;;  %5763 = vmatprep.subr.mxu0 %v6925_v63 }
  0xae   :  { %5807 = vmatpush3.msra.mxu1 %v6996_v13  ;;  %5764 = vmatpush3.msra.mxu0 %v6928_v0 }
  0xaf   :  { %5808 = vmatprep.subr.mxu1 %v6998_v44  ;;  %5765 = vmatprep.subr.mxu0 %v6936_v3 }
  0xb0   :  { %5809 = vmatpush3.msra.mxu1 %v7000_v45  ;;  %5766 = vmatpush3.msra.mxu0 %v6939_v6 }
  0xb1   :  { %5810 = vmatprep.subr.mxu1 %v7002_v38  ;;  %5767 = vmatprep.subr.mxu0 %v6942_v7 }
  0xb2   :  { %5811 = vmatpush3.msra.mxu1 %v7010_v51  ;;  %5768 = vmatpush3.msra.mxu0 %v6950_v14 }
  0xb3   :  { %5812 = vmatprep.subr.mxu1 %v7012_v52  ;;  %5769 = vmatprep.subr.mxu0 %v8513_v49 }
  0xb4   :  { %5813 = vmatpush3.msra.mxu1 %v7024_v47  ;;  %5770 = vmatpush3.msra.mxu0 %v8514_v27 }
  0xb5   :  { %5814 = vmatprep.subr.mxu1 %v7074_v29  ;;  %5771 = vmatprep.subr.mxu0 %v8515_v40 }
  0xb6   :  { %5815 = vmatpush3.msra.mxu1 %v8516_v50  ;;  %5772 = vmatpush3.msra.mxu0 %v8517_v41 }
  0xb7   :  { %5816 = vmatprep.subr.mxu1 %v7078_v32  ;;  %5773 = vmatprep.subr.mxu0 %v8518_v37  ;;  %v8523_v32 = vld [vmem:[#allocation20_spill] sm:$0xff] }
  0xb8   :  { %5817 = vmatpush3.msra.mxu1 %v7080_v48  ;;  %5774 = vmatpush3.msra.mxu0 %v8519_v36  ;;  %v8524_v36 = vld [vmem:[#allocation23_spill] sm:$0xff] }
  0xb9   :  { %5818 = vmatprep.subr.mxu1 %v7082_v31  ;;  %5775 = vmatprep.subr.mxu0 %v8520_v39  ;;  %v8525_v39 = vmov 1.0  }
  0xba   :  { %5819 = vmatpush3.msra.mxu1 %v7090_v54  ;;  %5776 = vmatpush3.msra.mxu0 %v8521_v59  ;;  %v8526_v59 = vld [vmem:[#allocation24_spill] sm:$0xff] }
  0xbb   :  { %5820 = vmatprep.subr.mxu1 %v7092_v55  ;;  %5777 = vmatprep.subr.mxu0 %v8522_v24  ;;  %v8527_v24 = vld [vmem:[#allocation25_spill] sm:$0xff] }
  0xbc   :  { %5821 = vmatpush3.msra.mxu1 %v7104_v28  ;;  %5778 = vmatpush3.msra.mxu0 %v8523_v32 }
  0xbd   :  { %691 = vmatmul.mubr.f32.vlgmr.msra.gmra.mxu1 %v210_v12  ;;  %5860 = vmatprep.subr.mxu1 %v6834_v4  ;;  %v8528_v12 = vld [vmem:[#allocation26_spill] sm:$0xff]  ;;  %v8529_v4 = vand.u32 4294901760, %v6845_v15  ;;  %v8533_v15 = vand.u32 4294901760, %v6862_v21 }
  0xbe   :  { %5779 = vmatprep.subr.mxu0 %v8524_v36  ;;  %5861 = vmatpush3.msra.mxu1 %v6836_v5  ;;  %v8530_v5 = vand.u32 4294901760, %v6848_v16  ;;  %v8534_v16 = vand.u32 4294901760, %v6870_v25  ;;  %v975_v21 = vld [vmem:[#allocation5 + $0x28] sm:$0xff] }
  0xbf   :  { %5676 = vmatprep.mubr.msk.f32.mxu1 %vm69_vm1, %v8525_v39  ;;  %5780 = vmatpush3.msra.mxu0 %v8526_v59 }
  0xc0   :  { %5862 = vmatprep.subr.mxu1 %v6838_v9  ;;  %5781 = vmatprep.subr.mxu0 %v8527_v24  ;;  %v8531_v9 = vand.u32 4294901760, %v6856_v19 }
  0xc1   :  { %5863 = vmatpush3.msra.mxu1 %v6840_v10  ;;  %5782 = vmatpush3.msra.mxu0 %v8528_v12  ;;  %v8532_v10 = vand.u32 4294901760, %v6859_v20  ;;  %v8536_v20 = vand.u32 4294901760, %v6880_v30 }
  0xc2   :  { %5864 = vmatprep.subr.mxu1 %v6842_v11  ;;  %5783 = vmatprep.subr.mxu0 %v7102_v33  ;;  %v977_v11 = vld [vmem:[#allocation5 + $0x38] sm:$0xff] }
  0xc3   :  { %5865 = vmatpush3.msra.mxu1 %v6850_v17  ;;  %5784 = vmatpush3.msra.mxu0 %v7110_v34  ;;  %v976_v17 = vld [vmem:[#allocation5 + $0x30] sm:$0xff]  ;;  %v7299_v19 = vand.u32 4294901760, %v977_v11 }
  0xc4   :  { %5866 = vmatprep.subr.mxu1 %v6852_v18  ;;  %5785 = vmatprep.subr.mxu0 %v7113_v23  ;;  %v8535_v18 = vand.u32 4294901760, %v6873_v26  ;;  %v7307_v25 = vand.u32 4294901760, %v976_v17  ;;  %v8538_v26 = vand.u32 4294901760, %v6928_v0  ;;  %v8542_v0 = vand.u32 4294901760, %v6950_v14 }
  0xc5   :  { %5867 = vmatpush3.msra.mxu1 %v6864_v22  ;;  %5786 = vmatpush3.msra.mxu0 %v7120_v58  ;;  %v8537_v22 = vand.u32 4294901760, %v6925_v63  ;;  %v7316_v30 = vsub.f32 %v977_v11, %v7299_v19  ;;  %v1020_v14 = vsel %vm1018_vm2, %v7159_v53, 0  ;;  %v8551_v53 = vld [vmem:[#allocation17_spill] sm:$0xff]  ;;  %v8561_v11 = vmov 0.0  }
  0xc6   :  { %5868 = vmatprep.subr.mxu1 %v6914_v56  ;;  %583 = vmatmul.mubr.f32.vlgmr.msra.gmra.mxu0 %v7191_v46  ;;  %v8539_v56 = vand.u32 4294901760, %v6936_v3  ;;  %v7327_v63 = vsub.f32 %v976_v17, %v7307_v25  ;;  %v8552_v43 = vand.u32 4294901760, %v8551_v53  ;;  %v7369_v46 = vand.u32 4294901760, %v1020_v14  ;;  %v993_v53 = vld [vmem:[#allocation5 + $0xa8] sm:$0xff] }
  0xc7   :  { %5825 = vmatprep.subr.mxu0 %v8529_v4  ;;  %5869 = vmatpush3.msra.mxu1 %v6916_v57  ;;  %v7318_v57 = vand.u32 4294901760, %v975_v21  ;;  %v8557_v4 = vand.u32 4294901760, %v8523_v32  ;;  %v8565_v17 = vand.u32 4294901760, %v7110_v34 }
  0xc8   :  { %5826 = vmatpush3.msra.mxu0 %v8530_v5  ;;  %5674 = vmatprep.mubr.msk.f32.mxu0 %vm69_vm1, %v8525_v39  ;;  %v8558_v5 = vld [vmem:[#allocation27_spill] sm:$0xff] }
  0xc9   :  { %5870 = vmatprep.subr.mxu1 %v6918_v60  ;;  %5827 = vmatprep.subr.mxu0 %v8531_v9  ;;  %v974_v60 = vld [vmem:[#allocation5 + $0x20] sm:$0xff]  ;;  %v7339_v3 = vsub.f32 %v975_v21, %v7318_v57  ;;  %v1514_v21 = vpop.permute.xlu0 %1513  ;;  %vm2992_vm4 = vcmp.ge.s32.totalorder %v8558_v5, 64  ;;  %vm2993_vm5 = vcmp.lt.s32.totalorder %v8558_v5, 96 }
  0xca   :  { %5871 = vmatpush3.msra.mxu1 %v6920_v61  ;;  %5828 = vmatpush3.msra.mxu0 %v8532_v10  ;;  %v8540_v61 = vand.u32 4294901760, %v6939_v6  ;;  %v8544_v6 = vand.u32 4294901760, %v8514_v27  ;;  %v8553_v27 = vld [vmem:[#allocation18_spill] sm:$0xff]  ;;  %v8560_v10 = vand.u32 4294901760, %v8526_v59  ;;  %vm7952_vm6 = vmand %vm2992_vm4, %vm2993_vm5 }
  0xcb   :  { %5872 = vmatprep.subr.mxu1 %v6922_v62  ;;  %5829 = vmatprep.subr.mxu0 %v8533_v15  ;;  %v8541_v62 = vand.u32 4294901760, %v6942_v7  ;;  %v8545_v7 = vand.u32 4294901760, %v8515_v40  ;;  %v8554_v40 = vand.u32 4294901760, %v8553_v27 }
  0xcc   :  { %5873 = vmatpush3.msra.mxu1 %v6930_v1  ;;  %5830 = vmatpush3.msra.mxu0 %v8534_v16  ;;  %v7332_v1 = vand.u32 4294901760, %v974_v60  ;;  %v8563_v16 = vand.u32 4294901760, %v8528_v12  ;;  %v8567_v12 = vand.u32 4294901760, %v7120_v58  ;;  %v985_v58 = vld [vmem:[#allocation5 + $0x70] sm:$0xff] }
  0xcd   :  { %5874 = vmatprep.subr.mxu1 %v6932_v2  ;;  %5831 = vmatprep.subr.mxu0 %v8535_v18  ;;  %v8543_v2 = vand.u32 4294901760, %v8513_v49  ;;  %v8566_v18 = vand.u32 4294901760, %v7113_v23  ;;  %v986_v23 = vld [vmem:[#allocation5 + $0x78] sm:$0xff] }
  0xce   :  { %5875 = vmatpush3.msra.mxu1 %v6944_v8  ;;  %5832 = vmatpush3.msra.mxu0 %v8536_v20  ;;  %v1135_v8 = vand.u32 4294901760, %v7327_v63  ;;  %v7440_v35 = vand.u32 4294901760, %v986_v23  ;;  %v7446_v20 = vand.u32 4294901760, %v985_v58 }
  0xcf   :  { %5876 = vmatprep.subr.mxu1 %v6994_v42  ;;  %5833 = vmatprep.subr.mxu0 %v8537_v22  ;;  %v7354_v42 = vsub.f32 %v974_v60, %v7332_v1  ;;  %v983_v22 = vld [vmem:[#allocation5 + $0x60] sm:$0xff]  ;;  %v1515_v60 = vsel %vm1018_vm2, %v1514_v21, 0 }
  0xd0   :  { %5877 = vmatpush3.msra.mxu1 %v6996_v13  ;;  %5834 = vmatpush3.msra.mxu0 %v8538_v26  ;;  %v8546_v13 = vand.u32 4294901760, %v8517_v41  ;;  %v1136_v49 = vsub.f32 %v7327_v63, %v1135_v8  ;;  %v7453_v26 = vsub.f32 %v986_v23, %v7440_v35  ;;  %v1004_v23 = vld [vmem:[#allocation5 + $0xf8] sm:$0xff] }
  0xd1   :  { %5878 = vmatprep.subr.mxu1 %v6998_v44  ;;  %5835 = vmatprep.subr.mxu0 %v8539_v56  ;;  %v8547_v44 = vld [vmem:[#allocation22_spill] sm:$0xff] }
  0xd2   :  { %5879 = vmatpush3.msra.mxu1 %v7000_v45  ;;  %5836 = vmatpush3.msra.mxu0 %v8540_v61  ;;  %v1137_v9 = vand.u32 4294901760, %v1136_v49  ;;  %v7464_v61 = vsub.f32 %v985_v58, %v7446_v20  ;;  %v992_v49 = vld [vmem:[#allocation5 + $0xa0] sm:$0xff]  ;;  %v1003_v58 = vld [vmem:[#allocation5 + $0xf0] sm:$0xff] }
  0xd3   :  { %5880 = vmatprep.subr.mxu1 %v7002_v38  ;;  %5837 = vmatprep.subr.mxu0 %v8541_v62  ;;  %v1128_v38 = vand.u32 4294901760, %v7316_v30  ;;  %v7466_v62 = vand.u32 4294901760, %v983_v22 }
  0xd4   :  { %5881 = vmatpush3.msra.mxu1 %v7010_v51  ;;  %5838 = vmatpush3.msra.mxu0 %v8542_v0  ;;  %v1142_v51 = vand.u32 4294901760, %v7339_v3  ;;  %v1623_v0 = vand.u32 4294901760, %v7453_v26 }
  0xd5   :  { %5882 = vmatprep.subr.mxu1 %v7012_v52  ;;  %5839 = vmatprep.subr.mxu0 %v8543_v2  ;;  %v1129_v45 = vsub.f32 %v7316_v30, %v1128_v38  ;;  %v8549_v52 = vld [vmem:[#allocation16_spill] sm:$0xff] }
  0xd6   :  { %5883 = vmatpush3.msra.mxu1 %v7024_v47  ;;  %5840 = vmatpush3.msra.mxu0 %v8544_v6  ;;  %v8550_v47 = vand.u32 4294901760, %v8549_v52  ;;  %v7478_v6 = vand.u32 4294901760, %v1515_v60  ;;  %v994_v52 = vld [vmem:[#allocation5 + $0xb0] sm:$0xff] }
  0xd7   :  { %5884 = vmatprep.subr.mxu1 %v7074_v29  ;;  %5841 = vmatprep.subr.mxu0 %v8545_v7  ;;  %v8548_v29 = vand.u32 4294901760, %v8518_v37  ;;  %v1130_v41 = vand.u32 4294901760, %v1129_v45  ;;  %v1143_v37 = vsub.f32 %v7339_v3, %v1142_v51  ;;  %v1630_v7 = vand.u32 4294901760, %v7464_v61 }
  0xd8   :  { %5885 = vmatpush3.msra.mxu1 %v8516_v50  ;;  %5842 = vmatpush3.msra.mxu0 %v8546_v13  ;;  %v8555_v50 = vld [vmem:[#allocation19_spill] sm:$0xff]  ;;  %v7485_v13 = vsub.f32 %v983_v22, %v7466_v62  ;;  %v1001_v22 = vld [vmem:[#allocation5 + $0xe0] sm:$0xff] }
  0xd9   :  { %5886 = vmatprep.subr.mxu1 %v8547_v44  ;;  %5843 = vmatprep.subr.mxu0 %v8548_v29  ;;  %v1144_v15 = vand.u32 4294901760, %v1143_v37 }
  0xda   :  { %5887 = vmatpush3.msra.mxu1 %v7080_v48  ;;  %5844 = vmatpush3.msra.mxu0 %v8550_v47  ;;  %v1149_v48 = vand.u32 4294901760, %v7354_v42 }
  0xdb   :  { %5888 = vmatprep.subr.mxu1 %v7082_v31  ;;  %5845 = vmatprep.subr.mxu0 %v8552_v43  ;;  %v8556_v31 = vand.u32 4294901760, %v8555_v50  ;;  %v7556_v43 = vand.u32 4294901760, %v994_v52 }
  0xdc   :  { %5889 = vmatpush3.msra.mxu1 %v7090_v54  ;;  %5846 = vmatpush3.msra.mxu0 %v8554_v40  ;;  %v7388_v54 = vsub.f32 %v1020_v14, %v7369_v46  ;;  %v1150_v32 = vsub.f32 %v7354_v42, %v1149_v48  ;;  %v7565_v40 = vand.u32 4294901760, %v993_v53 }
  0xdd   :  { %5890 = vmatprep.subr.mxu1 %v7092_v55  ;;  %5847 = vmatprep.subr.mxu0 %v8556_v31  ;;  %v8559_v55 = vand.u32 4294901760, %v8524_v36  ;;  %v8564_v36 = vand.u32 4294901760, %v7102_v33  ;;  %v7573_v50 = vsub.f32 %v994_v52, %v7556_v43  ;;  %v7575_v31 = vand.u32 4294901760, %v992_v49  ;;  %v972_v52 = vld [vmem:[#allocation5 + $0x10] sm:$0xff] }
  0xde   :  { %5891 = vmatpush3.msra.mxu1 %v7104_v28  ;;  %5848 = vmatpush3.msra.mxu0 %v8557_v4  ;;  %v8562_v28 = vand.u32 4294901760, %v8527_v24  ;;  %v1093_v59 = vand.u32 4294901760, %v7388_v54  ;;  %v1151_v24 = vand.u32 4294901760, %v1150_v32  ;;  %v7585_v37 = vsub.f32 %v993_v53, %v7565_v40  ;;  %v971_v53 = vld [vmem:[#allocation5 + $0x8] sm:$0xff] }
  0xdf   :  { %5677 = vmatmul.mubr.msk.f32.vlgmr.msra.gmra.mxu1 %vm68_vm0, %v8525_v39  ;;  %5849 = vmatprep.subr.mxu0 %v8559_v55  ;;  %v7597_v55 = vsub.f32 %v992_v49, %v7575_v31 }
  0xe0   :  { %5850 = vmatpush3.msra.mxu0 %v8560_v10  ;;  %6146 = vmatprep.subr.mxu1 %v8561_v11  ;;  %v1094_v33 = vsub.f32 %v7388_v54, %v1093_v59  ;;  %v2132_v10 = vand.u32 4294901760, %v7585_v37 }
  0xe1   :  { %5851 = vmatprep.subr.mxu0 %v8562_v28  ;;  %6147 = vmatpush3.msra.mxu1 %v1130_v41 }
  0xe2   :  { %5852 = vmatpush3.msra.mxu0 %v8563_v16  ;;  %6148 = vmatprep.subr.mxu1 %v8561_v11  ;;  %v1095_v34 = vand.u32 4294901760, %v1094_v33 }
  0xe3   :  { %5853 = vmatprep.subr.mxu0 %v8564_v36  ;;  %6149 = vmatpush3.msra.mxu1 %v1137_v9  ;;  %v2133_v36 = vsub.f32 %v7585_v37, %v2132_v10 }
  0xe4   :  { %5854 = vmatpush3.msra.mxu0 %v8565_v17  ;;  %6150 = vmatprep.subr.mxu1 %v8561_v11 }
  0xe5   :  { %5855 = vmatprep.subr.mxu0 %v8566_v18  ;;  %6151 = vmatpush3.msra.mxu1 %v1144_v15  ;;  %v2139_v15 = vand.u32 4294901760, %v7597_v55  ;;  %v2134_v18 = vand.u32 4294901760, %v2133_v36 }
  0xe6   :  { %5856 = vmatpush3.msra.mxu0 %v8567_v12  ;;  %6152 = vmatprep.subr.mxu1 %v8561_v11 }
  0xe7   :  { %5675 = vmatmul.mubr.msk.f32.vlgmr.msra.gmra.mxu0 %vm68_vm0, %v8525_v39  ;;  %6135 = vmatprep.subr.mxu0 %v8561_v11  ;;  %v984_v39 = vld [vmem:[#allocation5 + $0x68] sm:$0xff] }
  0xe8   :  { %6136 = vmatpush3.msra.mxu0 %v7299_v19  ;;  %6153 = vmatpush3.msra.mxu1 %v1151_v24  ;;  %v7455_v56 = vand.u32 4294901760, %v984_v39  ;;  %v2140_v24 = vsub.f32 %v7597_v55, %v2139_v15 }
  0xe9   :  { %6137 = vmatprep.subr.mxu0 %v8561_v11  ;;  %6143 = vmatprep.mubr.msk.f32.mxu0 %vm6768_vm3, %v8561_v11 }
  0xea   :  { %6138 = vmatpush3.msra.mxu0 %v7307_v25  ;;  %6154 = vmatprep.mubr.msk.f32.mxu1 %vm6768_vm3, %v8561_v11  ;;  %v7475_v2 = vsub.f32 %v984_v39, %v7455_v56  ;;  %v2141_v33 = vand.u32 4294901760, %v2140_v24  ;;  %v1002_v39 = vld [vmem:[#allocation5 + $0xe8] sm:$0xff] }
  0xeb   :  { %6139 = vmatprep.subr.mxu0 %v8561_v11  ;;  %6168 = vmatprep.subr.mxu1 %v8561_v11 }
  0xec   :  { %6140 = vmatpush3.msra.mxu0 %v7318_v57  ;;  %6155 = vmatmul.mubr.f32.vlgmr.msra.gmra.mxu1 %v7369_v46 }
  0xed   :  { %6141 = vmatprep.subr.mxu0 %v8561_v11  ;;  %6169 = vmatpush3.msra.mxu1 %v7299_v19 }
  0xee   :  { %6142 = vmatpush3.msra.mxu0 %v7332_v1  ;;  %6170 = vmatprep.subr.mxu1 %v8561_v11 }
  0xef   :  { %6157 = vmatprep.subr.mxu0 %v8561_v11  ;;  %6144 = vmatmul.mubr.f32.vlgmr.msra.gmra.mxu0 %v1095_v34 }
  0xf0   :  { %6158 = vmatpush3.msra.mxu0 %v7316_v30  ;;  %6171 = vmatpush3.msra.mxu1 %v7307_v25  ;;  %v1624_v30 = vsub.f32 %v7453_v26, %v1623_v0 }
  0xf1   :  { %6159 = vmatprep.subr.mxu0 %v8561_v11  ;;  %6172 = vmatprep.subr.mxu1 %v8561_v11 }
  0xf2   :  { %6160 = vmatpush3.msra.mxu0 %v7327_v63  ;;  %6173 = vmatpush3.msra.mxu1 %v7318_v57  ;;  %v1644_v63 = vand.u32 4294901760, %v7485_v13 }
  0xf3   :  { %6161 = vmatprep.subr.mxu0 %v8561_v11  ;;  %6174 = vmatprep.subr.mxu1 %v8561_v11 }
  0xf4   :  { %6162 = vmatpush3.msra.mxu0 %v7339_v3  ;;  %6175 = vmatpush3.msra.mxu1 %v7332_v1 }
  0xf5   :  { %6163 = vmatprep.subr.mxu0 %v8561_v11  ;;  %6165 = vmatprep.mubr.msk.f32.mxu0 %vm6768_vm3, %v8561_v11 }
  0xf6   :  { %6164 = vmatpush3.msra.mxu0 %v7354_v42  ;;  %6176 = vmatprep.mubr.msk.f32.mxu1 %vm6768_vm3, %v8561_v11 }
  0xf7   :  { %6179 = vmatprep.subr.mxu0 %v8561_v11  ;;  %6190 = vmatprep.subr.mxu1 %v8561_v11 }
  0xf8   :  { %6166 = vmatmul.mubr.f32.vlgmr.msra.gmra.mxu0 %v7388_v54  ;;  %6177 = vmatmul.mubr.f32.vlgmr.msra.gmra.mxu1 %v1093_v59  ;;  %v2125_v54 = vand.u32 4294901760, %v7573_v50 }
  0xf9   :  { %6180 = vmatpush3.msra.mxu0 %v1128_v38  ;;  %6191 = vmatpush3.msra.mxu1 %v7299_v19  ;;  %v1637_v19 = vand.u32 4294901760, %v7475_v2  ;;  %v7499_v38 = vsub.f32 %v1515_v60, %v7478_v6 }
  0xfa   :  { %6181 = vmatprep.subr.mxu0 %v8561_v11  ;;  %6192 = vmatprep.subr.mxu1 %v8561_v11  ;;  %v2126_v28 = vsub.f32 %v7573_v50, %v2125_v54 }
  0xfb   :  { %6182 = vmatpush3.msra.mxu0 %v1135_v8  ;;  %6193 = vmatpush3.msra.mxu1 %v7307_v25  ;;  %v1631_v25 = vsub.f32 %v7464_v61, %v1630_v7  ;;  %v1625_v8 = vand.u32 4294901760, %v1624_v30  ;;  %v1588_v3 = vand.u32 4294901760, %v7499_v38 }
  0xfc   :  { %6183 = vmatprep.subr.mxu0 %v8561_v11  ;;  %6194 = vmatprep.subr.mxu1 %v8561_v11  ;;  %v2127_v17 = vand.u32 4294901760, %v2126_v28 }
  0xfd   :  { %6184 = vmatpush3.msra.mxu0 %v1142_v51  ;;  %6195 = vmatpush3.msra.mxu1 %v7318_v57  ;;  %v1638_v57 = vsub.f32 %v7475_v2, %v1637_v19  ;;  %v1632_v14 = vand.u32 4294901760, %v1631_v25  ;;  %v1589_v44 = vsub.f32 %v7499_v38, %v1588_v3  ;;  %v995_v51 = vld [vmem:[#allocation5 + $0xb8] sm:$0xff] }
  0xfe   :  { %6185 = vmatprep.subr.mxu0 %v8561_v11  ;;  %6196 = vmatprep.subr.mxu1 %v8561_v11  ;;  %v7550_v47 = vand.u32 4294901760, %v995_v51 }
  0xff   :  { %6186 = vmatpush3.msra.mxu0 %v1149_v48  ;;  %6197 = vmatpush3.msra.mxu1 %v7332_v1  ;;  %v1645_v1 = vsub.f32 %v7485_v13, %v1644_v63  ;;  %v1639_v42 = vand.u32 4294901760, %v1638_v57  ;;  %v1590_v45 = vand.u32 4294901760, %v1589_v44 }
 0x100   :  { %6187 = vmatprep.mubr.msk.f32.mxu0 %vm6768_vm3, %v8561_v11  ;;  %6198 = vmatprep.mubr.msk.f32.mxu1 %vm6768_vm3, %v8561_v11  ;;  %v7563_v27 = vsub.f32 %v995_v51, %v7550_v47  ;;  %v973_v51 = vld [vmem:[#allocation5 + $0x18] sm:$0xff] }
 0x101   :  { %6201 = vmatprep.subr.mxu0 %v8561_v11  ;;  %6212 = vmatprep.subr.mxu1 %v8561_v11  ;;  %v1646_v29 = vand.u32 4294901760, %v1645_v1 }
 0x102   :  { %6188 = vmatmul.mubr.f32.vlgmr.msra.gmra.mxu0 %v7369_v46  ;;  %6199 = vmatmul.mubr.f32.vlgmr.msra.gmra.mxu1 %v7369_v46  ;;  %v2009_v46 = vpop.permute.xlu1 %2008  ;;  %v2118_v41 = vand.u32 4294901760, %v7563_v27 }
 0x103   :  { %6202 = vmatpush3.msra.mxu0 %v7440_v35  ;;  %6213 = vmatpush3.msra.mxu1 %v1625_v8  ;;  %v2010_v48 = vsel %vm1018_vm2, %v2009_v46, 0  ;;  %v970_v46 = vld [vmem:[#allocation5] sm:$0xff] }
 0x104   :  { %6203 = vmatprep.subr.mxu0 %v8561_v11  ;;  %6214 = vmatprep.subr.mxu1 %v8561_v11  ;;  %v7590_v4 = vand.u32 4294901760, %v2010_v48  ;;  %v2119_v9 = vsub.f32 %v7563_v27, %v2118_v41 }
 0x105   :  { %6204 = vmatpush3.msra.mxu0 %v7446_v20  ;;  %6215 = vmatpush3.msra.mxu1 %v1632_v14 }
 0x106   :  { %6205 = vmatprep.subr.mxu0 %v8561_v11  ;;  %6216 = vmatprep.subr.mxu1 %v8561_v11  ;;  %v7611_v32 = vsub.f32 %v2010_v48, %v7590_v4  ;;  %v2120_v16 = vand.u32 4294901760, %v2119_v9  ;;  %v2504_v21 = vpop.permute.xlu1 %2503  ;;  %v7798_v48 = vand.u32 4294901760, %v970_v46 }
 0x107   :  { %6206 = vmatpush3.msra.mxu0 %v7455_v56  ;;  %6217 = vmatpush3.msra.mxu1 %v1639_v42  ;;  %v2505_v60 = vsel %vm1018_vm2, %v2504_v21, 0 }
 0x108   :  { %6207 = vmatprep.subr.mxu0 %v8561_v11  ;;  %6218 = vmatprep.subr.mxu1 %v8561_v11  ;;  %v2083_v59 = vand.u32 4294901760, %v7611_v32 }
 0x109   :  { %6208 = vmatpush3.msra.mxu0 %v7466_v62  ;;  %6219 = vmatpush3.msra.mxu1 %v1646_v29 }
 0x10a   :  { %6209 = vmatprep.mubr.msk.f32.mxu0 %vm6768_vm3, %v8561_v11  ;;  %6220 = vmatprep.mubr.msk.f32.mxu1 %vm6768_vm3, %v8561_v11  ;;  %v2084_v12 = vsub.f32 %v7611_v32, %v2083_v59 }
 0x10b   :  { %6223 = vmatprep.subr.mxu0 %v8561_v11  ;;  %6234 = vmatprep.subr.mxu1 %v8561_v11 }
 0x10c   :  { %6210 = vmatmul.mubr.f32.vlgmr.msra.gmra.mxu0 %v1590_v45  ;;  %6221 = vmatmul.mubr.f32.vlgmr.msra.gmra.mxu1 %v7478_v6  ;;  %v2085_v34 = vand.u32 4294901760, %v2084_v12 }
 0x10d   :  { %6224 = vmatpush3.msra.mxu0 %v7453_v26  ;;  %6235 = vmatpush3.msra.mxu1 %v7440_v35 }
 0x10e   :  { %6225 = vmatprep.subr.mxu0 %v8561_v11  ;;  %6236 = vmatprep.subr.mxu1 %v8561_v11 }
 0x10f   :  { %6226 = vmatpush3.msra.mxu0 %v7464_v61  ;;  %6237 = vmatpush3.msra.mxu1 %v7446_v20 }
 0x110   :  { %6227 = vmatprep.subr.mxu0 %v8561_v11  ;;  %6238 = vmatprep.subr.mxu1 %v8561_v11 }
 0x111   :  { %6228 = vmatpush3.msra.mxu0 %v7475_v2  ;;  %6239 = vmatpush3.msra.mxu1 %v7455_v56 }
 0x112   :  { %6229 = vmatprep.subr.mxu0 %v8561_v11  ;;  %6240 = vmatprep.subr.mxu1 %v8561_v11 }
 0x113   :  { %6230 = vmatpush3.msra.mxu0 %v7485_v13  ;;  %6241 = vmatpush3.msra.mxu1 %v7466_v62 }
 0x114   :  { %6231 = vmatprep.mubr.msk.f32.mxu0 %vm6768_vm3, %v8561_v11  ;;  %6242 = vmatprep.mubr.msk.f32.mxu1 %vm6768_vm3, %v8561_v11 }
 0x115   :  { %6245 = vmatprep.subr.mxu0 %v8561_v11  ;;  %6256 = vmatprep.subr.mxu1 %v8561_v11 }
 0x116   :  { %6232 = vmatmul.mubr.f32.vlgmr.msra.gmra.mxu0 %v7499_v38  ;;  %6243 = vmatmul.mubr.f32.vlgmr.msra.gmra.mxu1 %v1588_v3 }
 0x117   :  { %6246 = vmatpush3.msra.mxu0 %v1623_v0  ;;  %6257 = vmatpush3.msra.mxu1 %v7440_v35  ;;  %v7662_v35 = vand.u32 4294901760, %v1004_v23 }
 0x118   :  { %6247 = vmatprep.subr.mxu0 %v8561_v11  ;;  %6258 = vmatprep.subr.mxu1 %v8561_v11 }
 0x119   :  { %6248 = vmatpush3.msra.mxu0 %v1630_v7  ;;  %6259 = vmatpush3.msra.mxu1 %v7446_v20  ;;  %v7668_v20 = vand.u32 4294901760, %v1003_v58  ;;  %v7675_v26 = vsub.f32 %v1004_v23, %v7662_v35 }
 0x11a   :  { %6249 = vmatprep.subr.mxu0 %v8561_v11  ;;  %6260 = vmatprep.subr.mxu1 %v8561_v11 }
 0x11b   :  { %6250 = vmatpush3.msra.mxu0 %v1637_v19  ;;  %6261 = vmatpush3.msra.mxu1 %v7455_v56  ;;  %v7677_v56 = vand.u32 4294901760, %v1002_v39  ;;  %v7685_v61 = vsub.f32 %v1003_v58, %v7668_v20  ;;  %v2613_v0 = vand.u32 4294901760, %v7675_v26 }
 0x11c   :  { %6251 = vmatprep.subr.mxu0 %v8561_v11  ;;  %6262 = vmatprep.subr.mxu1 %v8561_v11 }
 0x11d   :  { %6252 = vmatpush3.msra.mxu0 %v1644_v63  ;;  %6253 = vmatprep.mubr.msk.f32.mxu0 %vm6768_vm3, %v8561_v11  ;;  %v7697_v2 = vsub.f32 %v1002_v39, %v7677_v56  ;;  %v2620_v7 = vand.u32 4294901760, %v7685_v61  ;;  %v2614_v30 = vsub.f32 %v7675_v26, %v2613_v0 }
 0x11e   :  { %6263 = vmatpush3.msra.mxu1 %v7466_v62  ;;  %6264 = vmatprep.mubr.msk.f32.mxu1 %vm6768_vm3, %v8561_v11  ;;  %v7687_v62 = vand.u32 4294901760, %v1001_v22 }
 0x11f   :  { %6254 = vmatmul.mubr.f32.vlgmr.msra.gmra.mxu0 %v7478_v6  ;;  %6265 = vmatmul.mubr.f32.vlgmr.msra.gmra.mxu1 %v7478_v6  ;;  %v7702_v6 = vand.u32 4294901760, %v2505_v60  ;;  %v2627_v19 = vand.u32 4294901760, %v7697_v2  ;;  %v2621_v25 = vsub.f32 %v7685_v61, %v2620_v7  ;;  %v2615_v8 = vand.u32 4294901760, %v2614_v30  ;;  %v5681_v30 = vld [vmem:[%s8420_s5] ss:$0 sm:$0xff] }
 0x120   :  { %6267 = vmatprep.subr.mxu0 %v8561_v11  ;;  %6278 = vmatprep.subr.mxu1 %v8561_v11  ;;  %v7709_v13 = vsub.f32 %v1001_v22, %v7687_v62 }
 0x121   :  { %6268 = vmatpush3.msra.mxu0 %v7550_v47  ;;  %6279 = vmatpush3.msra.mxu1 %v2120_v16  ;;  %v7723_v38 = vsub.f32 %v2505_v60, %v7702_v6  ;;  %v2628_v57 = vsub.f32 %v7697_v2, %v2627_v19  ;;  %v2622_v14 = vand.u32 4294901760, %v2621_v25 }
 0x122   :  { %6269 = vmatprep.subr.mxu0 %v8561_v11  ;;  %6280 = vmatprep.subr.mxu1 %v8561_v11  ;;  %v2634_v63 = vand.u32 4294901760, %v7709_v13 }
 0x123   :  { %6270 = vmatpush3.msra.mxu0 %v7556_v43  ;;  %6281 = vmatpush3.msra.mxu1 %v2127_v17  ;;  %v2578_v3 = vand.u32 4294901760, %v7723_v38  ;;  %v2629_v42 = vand.u32 4294901760, %v2628_v57 }
 0x124   :  { %6271 = vmatprep.subr.mxu0 %v8561_v11  ;;  %6282 = vmatprep.subr.mxu1 %v8561_v11  ;;  %v2635_v1 = vsub.f32 %v7709_v13, %v2634_v63 }
 0x125   :  { %6272 = vmatpush3.msra.mxu0 %v7565_v40  ;;  %6283 = vmatpush3.msra.mxu1 %v2134_v18  ;;  %v2579_v44 = vsub.f32 %v7723_v38, %v2578_v3 }
 0x126   :  { %6273 = vmatprep.subr.mxu0 %v8561_v11  ;;  %6284 = vmatprep.subr.mxu1 %v8561_v11  ;;  %v2636_v29 = vand.u32 4294901760, %v2635_v1 }
 0x127   :  { %6274 = vmatpush3.msra.mxu0 %v7575_v31  ;;  %6285 = vmatpush3.msra.mxu1 %v2141_v33  ;;  %v2580_v45 = vand.u32 4294901760, %v2579_v44 }
 0x128   :  { %6275 = vmatprep.mubr.msk.f32.mxu0 %vm6768_vm3, %v8561_v11  ;;  %6286 = vmatprep.mubr.msk.f32.mxu1 %vm6768_vm3, %v8561_v11 }
 0x129   :  { %6289 = vmatprep.subr.mxu0 %v8561_v11  ;;  %6300 = vmatprep.subr.mxu1 %v8561_v11 }
 0x12a   :  { %6276 = vmatmul.mubr.f32.vlgmr.msra.gmra.mxu0 %v2085_v34  ;;  %6287 = vmatmul.mubr.f32.vlgmr.msra.gmra.mxu1 %v7590_v4 }
 0x12b   :  { %6290 = vmatpush3.msra.mxu0 %v7563_v27  ;;  %6301 = vmatpush3.msra.mxu1 %v7550_v47  ;;  %v7789_v27 = vand.u32 4294901760, %v971_v53 }
 0x12c   :  { %6291 = vmatprep.subr.mxu0 %v8561_v11  ;;  %6302 = vmatprep.subr.mxu1 %v8561_v11 }
 0x12d   :  { %6292 = vmatpush3.msra.mxu0 %v7573_v50  ;;  %6303 = vmatpush3.msra.mxu1 %v7556_v43 }
 0x12e   :  { %6293 = vmatprep.subr.mxu0 %v8561_v11  ;;  %6304 = vmatprep.subr.mxu1 %v8561_v11 }
 0x12f   :  { %6294 = vmatpush3.msra.mxu0 %v7585_v37  ;;  %6305 = vmatpush3.msra.mxu1 %v7565_v40  ;;  %v7818_v37 = vsub.f32 %v970_v46, %v7798_v48 }
 0x130   :  { %6295 = vmatprep.subr.mxu0 %v8561_v11  ;;  %6306 = vmatprep.subr.mxu1 %v8561_v11 }
 0x131   :  { %6296 = vmatpush3.msra.mxu0 %v7597_v55  ;;  %6307 = vmatpush3.msra.mxu1 %v7575_v31  ;;  %v3125_v9 = vand.u32 4294901760, %v7818_v37 }
 0x132   :  { %6297 = vmatprep.mubr.msk.f32.mxu0 %vm6768_vm3, %v8561_v11  ;;  %6308 = vmatprep.mubr.msk.f32.mxu1 %vm6768_vm3, %v8561_v11 }
 0x133   :  { %6311 = vmatprep.subr.mxu0 %v8561_v11  ;;  %6322 = vmatprep.subr.mxu1 %v8561_v11 }
 0x134   :  { %6298 = vmatmul.mubr.f32.vlgmr.msra.gmra.mxu0 %v7611_v32  ;;  %6309 = vmatmul.mubr.f32.vlgmr.msra.gmra.mxu1 %v2083_v59  ;;  %v7871_v59 = vld [vmem:[%s8418_s3] sm:$0xff] }
 0x135   :  { %6312 = vmatpush3.msra.mxu0 %v2118_v41  ;;  %6323 = vmatpush3.msra.mxu1 %v7550_v47  ;;  %v7774_v47 = vand.u32 4294901760, %v973_v51 }
 0x136   :  { %6313 = vmatprep.subr.mxu0 %v8561_v11  ;;  %6324 = vmatprep.subr.mxu1 %v8561_v11 }
 0x137   :  { %6314 = vmatpush3.msra.mxu0 %v2125_v54  ;;  %6325 = vmatpush3.msra.mxu1 %v7556_v43  ;;  %v7780_v43 = vand.u32 4294901760, %v972_v52  ;;  %v7787_v49 = vsub.f32 %v973_v51, %v7774_v47 }
 0x138   :  { %6315 = vmatprep.subr.mxu0 %v8561_v11  ;;  %6326 = vmatprep.subr.mxu1 %v8561_v11 }
 0x139   :  { %6316 = vmatpush3.msra.mxu0 %v2132_v10  ;;  %6327 = vmatpush3.msra.mxu1 %v7565_v40  ;;  %v7796_v40 = vsub.f32 %v972_v52, %v7780_v43  ;;  %v3104_v50 = vand.u32 4294901760, %v7787_v49 }
 0x13a   :  { %6317 = vmatprep.subr.mxu0 %v8561_v11  ;;  %6328 = vmatprep.subr.mxu1 %v8561_v11 }
 0x13b   :  { %6318 = vmatpush3.msra.mxu0 %v2139_v15  ;;  %6319 = vmatprep.mubr.msk.f32.mxu0 %vm6768_vm3, %v8561_v11  ;;  %v3111_v41 = vand.u32 4294901760, %v7796_v40  ;;  %v3126_v15 = vsub.f32 %v7818_v37, %v3125_v9 }
 0x13c   :  { %6329 = vmatpush3.msra.mxu1 %v7575_v31  ;;  %6330 = vmatprep.mubr.msk.f32.mxu1 %vm6768_vm3, %v8561_v11  ;;  %v7808_v31 = vsub.f32 %v971_v53, %v7789_v27 }
 0x13d   :  { %6320 = vmatmul.mubr.f32.vlgmr.msra.gmra.mxu0 %v7590_v4  ;;  %6331 = vmatmul.mubr.f32.vlgmr.msra.gmra.mxu1 %v7590_v4  ;;  %v3105_v4 = vsub.f32 %v7787_v49, %v3104_v50  ;;  %v3112_v55 = vsub.f32 %v7796_v40, %v3111_v41  ;;  %v3127_v36 = vand.u32 4294901760, %v3126_v15 }
 0x13e   :  { %6333 = vmatprep.subr.mxu0 %v8561_v11  ;;  %6344 = vmatprep.subr.mxu1 %v8561_v11  ;;  %v3118_v54 = vand.u32 4294901760, %v7808_v31 }
 0x13f   :  { %6334 = vmatpush3.msra.mxu0 %v7662_v35  ;;  %6345 = vmatpush3.msra.mxu1 %v2615_v8  ;;  %v3106_v10 = vand.u32 4294901760, %v3105_v4  ;;  %v3113_v28 = vand.u32 4294901760, %v3112_v55 }
 0x140   :  { %6335 = vmatprep.subr.mxu0 %v8561_v11  ;;  %6346 = vmatprep.subr.mxu1 %v8561_v11  ;;  %v3119_v32 = vsub.f32 %v7808_v31, %v3118_v54 }
 0x141   :  { %6336 = vmatpush3.msra.mxu0 %v7668_v20  ;;  %6347 = vmatpush3.msra.mxu1 %v2622_v14 }
 0x142   :  { %6337 = vmatprep.subr.mxu0 %v8561_v11  ;;  %6348 = vmatprep.subr.mxu1 %v8561_v11  ;;  %v3120_v16 = vand.u32 4294901760, %v3119_v32 }
 0x143   :  { %6338 = vmatpush3.msra.mxu0 %v7677_v56  ;;  %6349 = vmatpush3.msra.mxu1 %v2629_v42 }
 0x144   :  { %6339 = vmatprep.subr.mxu0 %v8561_v11  ;;  %6350 = vmatprep.subr.mxu1 %v8561_v11 }
 0x145   :  { %6340 = vmatpush3.msra.mxu0 %v7687_v62  ;;  %6351 = vmatpush3.msra.mxu1 %v2636_v29 }
 0x146   :  { %6341 = vmatprep.mubr.msk.f32.mxu0 %vm6768_vm3, %v8561_v11  ;;  %6352 = vmatprep.mubr.msk.f32.mxu1 %vm6768_vm3, %v8561_v11 }
 0x147   :  { %6355 = vmatprep.subr.mxu0 %v8561_v11  ;;  %6366 = vmatprep.subr.mxu1 %v8561_v11 }
 0x148   :  { %6342 = vmatmul.mubr.f32.vlgmr.msra.gmra.mxu0 %v2580_v45  ;;  %6353 = vmatmul.mubr.f32.vlgmr.msra.gmra.mxu1 %v7702_v6 }
 0x149   :  { %6356 = vmatpush3.msra.mxu0 %v7675_v26  ;;  %6367 = vmatpush3.msra.mxu1 %v7662_v35 }
 0x14a   :  { %6357 = vmatprep.subr.mxu0 %v8561_v11  ;;  %6368 = vmatprep.subr.mxu1 %v8561_v11 }
 0x14b   :  { %6358 = vmatpush3.msra.mxu0 %v7685_v61  ;;  %6369 = vmatpush3.msra.mxu1 %v7668_v20 }
 0x14c   :  { %6359 = vmatprep.subr.mxu0 %v8561_v11  ;;  %6370 = vmatprep.subr.mxu1 %v8561_v11 }
 0x14d   :  { %6360 = vmatpush3.msra.mxu0 %v7697_v2  ;;  %6371 = vmatpush3.msra.mxu1 %v7677_v56 }
 0x14e   :  { %6361 = vmatprep.subr.mxu0 %v8561_v11  ;;  %6372 = vmatprep.subr.mxu1 %v8561_v11 }
 0x14f   :  { %6362 = vmatpush3.msra.mxu0 %v7709_v13  ;;  %6373 = vmatpush3.msra.mxu1 %v7687_v62 }
 0x150   :  { %6363 = vmatprep.mubr.msk.f32.mxu0 %vm6768_vm3, %v8561_v11  ;;  %6374 = vmatprep.mubr.msk.f32.mxu1 %vm6768_vm3, %v8561_v11 }
 0x151   :  { %6377 = vmatprep.subr.mxu0 %v8561_v11  ;;  %6388 = vmatprep.subr.mxu1 %v8561_v11 }
 0x152   :  { %6364 = vmatmul.mubr.f32.vlgmr.msra.gmra.mxu0 %v7723_v38  ;;  %6375 = vmatmul.mubr.f32.vlgmr.msra.gmra.mxu1 %v2578_v3 }
 0x153   :  { %6378 = vmatpush3.msra.mxu0 %v2613_v0  ;;  %6389 = vmatpush3.msra.mxu1 %v7662_v35 }
 0x154   :  { %6379 = vmatprep.subr.mxu0 %v8561_v11  ;;  %6390 = vmatprep.subr.mxu1 %v8561_v11 }
 0x155   :  { %6380 = vmatpush3.msra.mxu0 %v2620_v7  ;;  %6391 = vmatpush3.msra.mxu1 %v7668_v20 }
 0x156   :  { %6381 = vmatprep.subr.mxu0 %v8561_v11  ;;  %6392 = vmatprep.subr.mxu1 %v8561_v11 }
 0x157   :  { %6382 = vmatpush3.msra.mxu0 %v2627_v19  ;;  %6393 = vmatpush3.msra.mxu1 %v7677_v56 }
 0x158   :  { %6383 = vmatprep.subr.mxu0 %v8561_v11  ;;  %6394 = vmatprep.subr.mxu1 %v8561_v11 }
 0x159   :  { %6384 = vmatpush3.msra.mxu0 %v2634_v63  ;;  %6385 = vmatprep.mubr.msk.f32.mxu0 %vm6768_vm3, %v8561_v11 }
 0x15a   :  { %6395 = vmatpush3.msra.mxu1 %v7687_v62  ;;  %6396 = vmatprep.mubr.msk.f32.mxu1 %vm6768_vm3, %v8561_v11 }
 0x15b   :  { %6386 = vmatmul.mubr.f32.vlgmr.msra.gmra.mxu0 %v7702_v6  ;;  %6397 = vmatmul.mubr.f32.vlgmr.msra.gmra.mxu1 %v7702_v6 }
 0x15c   :  { %6410 = vmatprep.subr.mxu1 %v8561_v11  ;;  %6399 = vmatprep.subr.mxu0 %v8561_v11  ;;  %v5752_v24 = vpop.f32.mrf.mxu1 }
 0x15d   :  { %6411 = vmatpush3.msra.mxu1 %v3106_v10  ;;  %6418 = vmatprep.mubr.msk.f32.mxu1 %vm6768_vm3, %v8561_v11 }
 0x15e   :  { %6412 = vmatprep.subr.mxu1 %v8561_v11  ;;  %6400 = vmatpush3.msra.mxu0 %v7774_v47  ;;  %v5753_v33 = vpop.f32.mrf.mxu1 }
 0x15f   :  { %6413 = vmatpush3.msra.mxu1 %v3113_v28  ;;  %6401 = vmatprep.subr.mxu0 %v8561_v11  ;;  %v5754_v35 = vadd.f32 %v5753_v33, %v5752_v24 }
 0x160   :  { %6414 = vmatprep.subr.mxu1 %v8561_v11  ;;  %6402 = vmatpush3.msra.mxu0 %v7780_v43 }
 0x161   :  { %6415 = vmatpush3.msra.mxu1 %v3120_v16  ;;  %6403 = vmatprep.subr.mxu0 %v8561_v11 }
 0x162   :  { %6416 = vmatprep.subr.mxu1 %v8561_v11  ;;  %6404 = vmatpush3.msra.mxu0 %v7789_v27 }
 0x163   :  { %6417 = vmatpush3.msra.mxu1 %v3127_v36  ;;  %6405 = vmatprep.subr.mxu0 %v8561_v11 }
 0x164   :  { %6432 = vmatprep.subr.mxu1 %v8561_v11  ;;  %6406 = vmatpush3.msra.mxu0 %v7798_v48 }
 0x165   :  { %6407 = vmatprep.mubr.msk.f32.mxu0 %vm6768_vm3, %v8561_v11  ;;  %6421 = vmatprep.subr.mxu0 %v8561_v11  ;;  %v5717_v17 = vpop.f32.mrf.mxu0 }
 0x166   :  { %3488 = vrot.lane.b32.xlu1 %v7871_v59, %s6765_s28 }
 0x167   :  { %v5718_v18 = vpop.f32.mrf.mxu0 }
 0x168   :  { %v5719_v58 = vadd.f32 %v5718_v18, %v5717_v17 }
 0x16a   :  { %v447_v21 = vadd.f32 %v5754_v35, %v5719_v58 }
 0x17d   :  { %v5822_v34 = vpop.f32.mrf.mxu1 }
 0x17f   :  { %v5823_v20 = vpop.f32.mrf.mxu1 }
 0x180   :  { %v5824_v60 = vadd.f32 %v5823_v20, %v5822_v34 }
 0x186   :  { %v5787_v12 = vpop.f32.mrf.mxu0 }
 0x188   :  { %v5788_v23 = vpop.f32.mrf.mxu0 }
 0x189   :  { %v5789_v39 = vadd.f32 %v5788_v23, %v5787_v12  ;;  %v5683_v23 = vld [vmem:[%s8420_s5 + $0x2] ss:$0 sm:$0xff] }
 0x18b   :  { %v585_v26 = vadd.f32 %v5789_v39, %v447_v21 }
 0x18d   :  { %v693_v0 = vadd.f32 %v5824_v60, %v585_v26 }
 0x19f   :  { %v5892_v22 = vpop.f32.mrf.mxu1 }
 0x1a1   :  { %v5893_v61 = vpop.f32.mrf.mxu1 }
 0x1a2   :  { %v5894_v6 = vadd.f32 %v5893_v61, %v5892_v22 }
 0x1a7   :  { %v5857_v56 = vpop.f32.mrf.mxu0 }
 0x1a9   :  { %v5858_v62 = vpop.f32.mrf.mxu0 }
 0x1aa   :  { %v5859_v2 = vadd.f32 %v5858_v62, %v5857_v56 }
 0x1ac   :  { %v861_v7 = vadd.f32 %v5859_v2, %v693_v0  ;;  %v1188_v13 = vpop.f32.mrf.mxu1 }
 0x1ae   :  { %v965_v19 = vadd.f32 %v5894_v6, %v861_v7  ;;  %v6156_v38 = vpop.f32.mrf.mxu1 }
 0x1af   :  { %v1097_v25 = vpop.f32.mrf.mxu0  ;;  %v5684_v38 = vld [vmem:[%s8420_s5 + $0x3] ss:$0 sm:$0xff] }
 0x1b0   :  { %v2996_v63 = vsel %vm1018_vm2, %v965_v19, 0  ;;  %v1098_v8 = vadd.f32 %v5681_v30, %v1097_v25 }
 0x1b1   :  { %v3067_v57 = vand.u32 4294901760, %v2996_v63  ;;  %v6145_v3 = vpop.f32.mrf.mxu0 }
 0x1b2   :  { %v1189_v14 = vadd.f32 %v1188_v13, %v1098_v8 }
 0x1b3   :  { %v3068_v1 = vsub.f32 %v2996_v63, %v3067_v57  ;;  %6419 = vmatmul.mubr.f32.vlgmr.msra.gmra.mxu1 %v3067_v57 }
 0x1b4   :  { %6433 = vmatpush3.msra.mxu1 %v7774_v47  ;;  %6440 = vmatprep.mubr.msk.f32.mxu1 %vm6768_vm3, %v8561_v11 }
 0x1b5   :  { %6434 = vmatprep.subr.mxu1 %v8561_v11  ;;  %v3069_v42 = vand.u32 4294901760, %v3068_v1 }
 0x1b6   :  { %6435 = vmatpush3.msra.mxu1 %v7780_v43 }
 0x1b7   :  { %6436 = vmatprep.subr.mxu1 %v8561_v11  ;;  %v3070_v44 = vsub.f32 %v3068_v1, %v3069_v42 }
 0x1b8   :  { %6437 = vmatpush3.msra.mxu1 %v7789_v27  ;;  %v1268_v29 = vpop.f32.mrf.mxu0  ;;  %v1345_v45 = vpop.f32.mrf.mxu1 }
 0x1b9   :  { %6438 = vmatprep.subr.mxu1 %v8561_v11  ;;  %v3071_v51 = vand.u32 4294901760, %v3070_v44  ;;  %v1269_v52 = vadd.f32 %v1268_v29, %v1189_v14 }
 0x1ba   :  { %6439 = vmatpush3.msra.mxu1 %v7798_v48  ;;  %v6167_v53 = vpop.f32.mrf.mxu0  ;;  %v6178_v46 = vpop.f32.mrf.mxu1 }
 0x1bb   :  { %6441 = vmatmul.mubr.f32.vlgmr.msra.gmra.mxu1 %v3069_v42  ;;  %6454 = vmatprep.subr.mxu1 %v8561_v11  ;;  %v1346_v4 = vadd.f32 %v1345_v45, %v1269_v52 }
 0x1bc   :  { %6408 = vmatmul.mubr.f32.vlgmr.msra.gmra.mxu0 %v3071_v51  ;;  %6455 = vmatpush3.msra.mxu1 %v7774_v47 }
 0x1bd   :  { %6422 = vmatpush3.msra.mxu0 %v7787_v49  ;;  %6456 = vmatprep.subr.mxu1 %v8561_v11  ;;  %v5682_v49 = vld [vmem:[%s8420_s5 + $0x1] ss:$0 sm:$0xff] }
 0x1be   :  { %6423 = vmatprep.subr.mxu0 %v8561_v11  ;;  %6457 = vmatpush3.msra.mxu1 %v7780_v43 }
 0x1bf   :  { %6424 = vmatpush3.msra.mxu0 %v7796_v40  ;;  %6458 = vmatprep.subr.mxu1 %v8561_v11 }
 0x1c0   :  { %6425 = vmatprep.subr.mxu0 %v8561_v11  ;;  %6459 = vmatpush3.msra.mxu1 %v7789_v27 }
 0x1c1   :  { %6426 = vmatpush3.msra.mxu0 %v7808_v31  ;;  %6460 = vmatprep.subr.mxu1 %v8561_v11 }
 0x1c2   :  { %6427 = vmatprep.subr.mxu0 %v8561_v11  ;;  %6429 = vmatprep.mubr.msk.f32.mxu0 %vm6768_vm3, %v8561_v11  ;;  %v1428_v47 = vpop.f32.mrf.mxu0  ;;  %v1503_v55 = vpop.f32.mrf.mxu1 }
 0x1c3   :  { %6428 = vmatpush3.msra.mxu0 %v7818_v37  ;;  %6461 = vmatpush3.msra.mxu1 %v7798_v48  ;;  %v1429_v43 = vadd.f32 %v1428_v47, %v1346_v4 }
 0x1c4   :  { %6462 = vmatprep.mubr.msk.f32.mxu1 %vm6768_vm3, %v8561_v11  ;;  %6430 = vmatmul.mubr.f32.vlgmr.msra.gmra.mxu0 %v3068_v1  ;;  %v6189_v27 = vpop.f32.mrf.mxu0  ;;  %v6200_v10 = vpop.f32.mrf.mxu1 }
 0x1c5   :  { %6443 = vmatprep.subr.mxu0 %v8561_v11  ;;  %6463 = vmatmul.mubr.f32.vlgmr.msra.gmra.mxu1 %v3067_v57  ;;  %v7913_v32 = vadd.f32 %v1503_v55, %v1429_v43 }
 0x1c6   :  { %6444 = vmatpush3.msra.mxu0 %v3104_v50  ;;  %6451 = vmatprep.mubr.msk.f32.mxu0 %vm6768_vm3, %v8561_v11 }
 0x1c7   :  { %6445 = vmatprep.subr.mxu0 %v8561_v11  ;;  %6476 = vmatprep.subr.mxu1 %v8561_v11 }
 0x1c8   :  { %6446 = vmatpush3.msra.mxu0 %v3111_v41  ;;  %6484 = vmatprep.mubr.msk.f32.mxu1 %vm6768_vm3, %v8561_v11 }
 0x1c9   :  { %6447 = vmatprep.subr.mxu0 %v8561_v11 }
 0x1ca   :  { %6448 = vmatpush3.msra.mxu0 %v3118_v54 }
 0x1cb   :  { %6449 = vmatprep.subr.mxu0 %v8561_v11 }
 0x1cc   :  { %6450 = vmatpush3.msra.mxu0 %v3125_v9  ;;  %v1592_v48 = vpop.f32.mrf.mxu0  ;;  %v1683_v40 = vpop.f32.mrf.mxu1 }
 0x1cd   :  { %6452 = vmatmul.mubr.f32.vlgmr.msra.gmra.mxu0 %v3067_v57  ;;  %v1593_v50 = vadd.f32 %v5682_v49, %v1592_v48  ;;  %6465 = vmatprep.subr.mxu0 %v8561_v11 }
 0x1ce   :  { %v6211_v41 = vpop.f32.mrf.mxu0  ;;  %v6222_v28 = vpop.f32.mrf.mxu1  ;;  %6473 = vmatprep.mubr.msk.f32.mxu0 %vm6768_vm3, %v8561_v11 }
 0x1cf   :  { %v1684_v31 = vadd.f32 %v1683_v40, %v1593_v50 }
 0x1d6   :  { %v1763_v54 = vpop.f32.mrf.mxu0  ;;  %v1840_v15 = vpop.f32.mrf.mxu1 }
 0x1d7   :  { %v1764_v16 = vadd.f32 %v1763_v54, %v1684_v31 }
 0x1d8   :  { %v6233_v36 = vpop.f32.mrf.mxu0  ;;  %v6244_v17 = vpop.f32.mrf.mxu1 }
 0x1d9   :  { %v1841_v24 = vadd.f32 %v1840_v15, %v1764_v16 }
 0x1df   :  { %v1923_v37 = vpop.f32.mrf.mxu0  ;;  %v1998_v9 = vpop.f32.mrf.mxu1 }
 0x1e0   :  { %v1924_v18 = vadd.f32 %v1923_v37, %v1841_v24 }
 0x1e1   :  { %v6255_v12 = vpop.f32.mrf.mxu0  ;;  %v6266_v33 = vpop.f32.mrf.mxu1 }
 0x1e2   :  { %v7937_v34 = vadd.f32 %v1998_v9, %v1924_v18 }
 0x1ea   :  { %v2087_v58 = vpop.f32.mrf.mxu0  ;;  %v2178_v35 = vpop.f32.mrf.mxu1 }
 0x1eb   :  { %v2088_v39 = vadd.f32 %v5683_v23, %v2087_v58 }
 0x1ec   :  { %v6277_v20 = vpop.f32.mrf.mxu0  ;;  %v6288_v21 = vpop.f32.mrf.mxu1 }
 0x1ed   :  { %v2179_v22 = vadd.f32 %v2178_v35, %v2088_v39  ;;  %v3489_v39 = vpop.permute.xlu1 %3488 }
 0x1f4   :  { %v2258_v26 = vpop.f32.mrf.mxu0  ;;  %v2335_v56 = vpop.f32.mrf.mxu1 }
 0x1f5   :  { %v2259_v60 = vadd.f32 %v2258_v26, %v2179_v22  ;;  %v982_v22 = vld [vmem:[#allocation5 + $0x58] sm:$0xff]  ;;  %v981_v26 = vld [vmem:[#allocation5 + $0x50] sm:$0xff] }
 0x1f6   :  { %v6299_v61 = vpop.f32.mrf.mxu0  ;;  %v6310_v62 = vpop.f32.mrf.mxu1 }
 0x1f7   :  { %v2336_v0 = vadd.f32 %v2335_v56, %v2259_v60  ;;  %v980_v56 = vld [vmem:[#allocation5 + $0x48] sm:$0xff]  ;;  %v3538_v60 = vand.u32 4294901760, %v982_v22  ;;  %v7963_v61 = vand.u32 4294901760, %v981_v26 }
 0x1f8   :  { %v7965_v62 = vand.u32 4294901760, %v980_v56 }
 0x1f9   :  { %6466 = vmatpush3.msra.mxu0 %v3538_v60 }
 0x1fa   :  { %6467 = vmatprep.subr.mxu0 %v8561_v11 }
 0x1fb   :  { %6468 = vmatpush3.msra.mxu0 %v7963_v61 }
 0x1fc   :  { %6469 = vmatprep.subr.mxu0 %v8561_v11 }
 0x1fd   :  { %v2418_v2 = vpop.f32.mrf.mxu0  ;;  %v2493_v6 = vpop.f32.mrf.mxu1  ;;  %6470 = vmatpush3.msra.mxu0 %v7965_v62 }
 0x1fe   :  { %v2419_v7 = vadd.f32 %v2418_v2, %v2336_v0  ;;  %v7967_v0 = vsub.f32 %v982_v22, %v3538_v60  ;;  %v7970_v2 = vsub.f32 %v981_v26, %v7963_v61  ;;  %6471 = vmatprep.subr.mxu0 %v8561_v11 }
 0x1ff   :  { %v6321_v13 = vpop.f32.mrf.mxu0  ;;  %v6332_v30 = vpop.f32.mrf.mxu1 }
 0x200   :  { %v7942_v19 = vadd.f32 %v2493_v6, %v2419_v7  ;;  %v7973_v6 = vsub.f32 %v980_v56, %v7965_v62  ;;  %v3619_v7 = vand.u32 4294901760, %v7967_v0  ;;  %v3626_v13 = vand.u32 4294901760, %v7970_v2 }
 0x202   :  { %v3633_v30 = vand.u32 4294901760, %v7973_v6 }
 0x208   :  { %v2582_v25 = vpop.f32.mrf.mxu0  ;;  %v2673_v63 = vpop.f32.mrf.mxu1 }
 0x209   :  { %v2583_v8 = vadd.f32 %v5684_v38, %v2582_v25  ;;  %v3620_v38 = vsub.f32 %v7967_v0, %v3619_v7  ;;  %v3627_v25 = vsub.f32 %v7970_v2, %v3626_v13 }
 0x20a   :  { %v6343_v57 = vpop.f32.mrf.mxu0  ;;  %v6354_v3 = vpop.f32.mrf.mxu1 }
 0x20b   :  { %v2674_v14 = vadd.f32 %v2673_v63, %v2583_v8  ;;  %v3634_v63 = vsub.f32 %v7973_v6, %v3633_v30  ;;  %v3621_v8 = vand.u32 4294901760, %v3620_v38  ;;  %v3628_v57 = vand.u32 4294901760, %v3627_v25 }
 0x20d   :  { %6477 = vmatpush3.msra.mxu1 %v3621_v8 }
 0x20e   :  { %6478 = vmatprep.subr.mxu1 %v8561_v11 }
 0x20f   :  { %6479 = vmatpush3.msra.mxu1 %v3628_v57 }
 0x210   :  { %6480 = vmatprep.subr.mxu1 %v8561_v11 }
 0x212   :  { %v2753_v1 = vpop.f32.mrf.mxu0  ;;  %v2830_v42 = vpop.f32.mrf.mxu1 }
 0x213   :  { %v2754_v44 = vadd.f32 %v2753_v1, %v2674_v14  ;;  %v3635_v14 = vand.u32 4294901760, %v3634_v63  ;;  %v979_v1 = vld [vmem:[#allocation5 + $0x40] sm:$0xff] }
 0x214   :  { %v6365_v29 = vpop.f32.mrf.mxu0  ;;  %v6376_v45 = vpop.f32.mrf.mxu1 }
 0x215   :  { %v2831_v51 = vadd.f32 %v2830_v42, %v2754_v44  ;;  %6481 = vmatpush3.msra.mxu1 %v3635_v14  ;;  %v3547_v42 = vand.u32 4294901760, %v979_v1 }
 0x216   :  { %6482 = vmatprep.subr.mxu1 %v8561_v11 }
 0x217   :  { %v3639_v44 = vsub.f32 %v979_v1, %v3547_v42  ;;  %6472 = vmatpush3.msra.mxu0 %v3547_v42 }
 0x218   :  { %6487 = vmatprep.subr.mxu0 %v8561_v11 }
 0x219   :  { %v3640_v29 = vand.u32 4294901760, %v3639_v44 }
 0x21b   :  { %v2913_v52 = vpop.f32.mrf.mxu0  ;;  %v2988_v53 = vpop.f32.mrf.mxu1  ;;  %v3641_v45 = vsub.f32 %v3639_v44, %v3640_v29 }
 0x21c   :  { %v2914_v46 = vadd.f32 %v2913_v52, %v2831_v51 }
 0x21d   :  { %v6387_v4 = vpop.f32.mrf.mxu0  ;;  %v6398_v47 = vpop.f32.mrf.mxu1  ;;  %v3642_v51 = vand.u32 4294901760, %v3641_v45 }
 0x21e   :  { %v7947_v55 = vadd.f32 %v2988_v53, %v2914_v46 }
 0x21f   :  { %6483 = vmatpush3.msra.mxu1 %v3642_v51 }
 0x220   :  { %6498 = vmatprep.subr.mxu1 %v8561_v11 }
 0x273   :  { %v3164_v43 = vpop.f32.mrf.mxu1 }
 0x275   :  { %v6420_v27 = vpop.f32.mrf.mxu1 }
 0x27b   :  { %v3321_v10 = vpop.f32.mrf.mxu1 }
 0x27c   :  { %v3073_v49 = vpop.f32.mrf.mxu0 }
 0x27d   :  { %v6442_v48 = vpop.f32.mrf.mxu1  ;;  %v3074_v50 = vadd.f32 %v3073_v49, %v7913_v32  ;;  %v5083_v32 = vld [vmem:[%s8421_s6 + $0x38] sm:$0xff] }
 0x27e   :  { %v6409_v40 = vpop.f32.mrf.mxu0 }
 0x27f   :  { %v3165_v31 = vadd.f32 %v3164_v43, %v3074_v50 }
 0x284   :  { %v3244_v41 = vpop.f32.mrf.mxu0 }
 0x285   :  { %v3479_v28 = vpop.f32.mrf.mxu1  ;;  %v3245_v16 = vadd.f32 %v3244_v41, %v3165_v31 }
 0x286   :  { %v6431_v54 = vpop.f32.mrf.mxu0 }
 0x287   :  { %v6464_v15 = vpop.f32.mrf.mxu1  ;;  %v3322_v36 = vadd.f32 %v3321_v10, %v3245_v16 }
 0x28d   :  { %v3404_v17 = vpop.f32.mrf.mxu0 }
 0x28e   :  { %v3405_v24 = vadd.f32 %v3404_v17, %v3322_v36 }
 0x28f   :  { %v6453_v37 = vpop.f32.mrf.mxu0 }
 0x290   :  { %v3480_v9 = vadd.f32 %v3479_v28, %v3405_v24 }
 0x292   :  { %6676 = vtanh.f32 %v3480_v9 }
 0x29f   :  { %v6677_v18 = vpop.eup %6676 }
 0x2a0   :  { %v3484_v12 = vmul.f32 0.5, %v6677_v18 }
 0x2a2   :  { %v3485_v33 = vadd.f32 0.5, %v3484_v12 }
 0x2a4   :  { %v3486_v23 = vsel %vm7952_vm6, %v6677_v18, %v3485_v33 }
 0x2a5   :  { %3493 = vrot.lane.b32.xlu0 %v3486_v23, %s6764_s27  ;;  %v3491_v20 = vmul.f32 %v3489_v39, %v3486_v23 }
 0x317   :  { %v3494_v58 = vpop.permute.xlu0 %3493 }
 0x318   :  { %v3496_v35 = vmul.f32 %v3494_v58, %v3486_v23 }
 0x31a   :  { %3498 = vrot.lane.b32.xlu0 %v3496_v35, %s6765_s28 }
 0x38c   :  { %v3499_v21 = vpop.permute.xlu0 %3498 }
 0x38d   :  { %v7960_v5 = vadd.f32 %v3499_v21, %v3491_v20 }
 0x38f   :  { %6678 = vtanh.f32 %v7960_v5 }
 0x39c   :  { %v6679_v3 = vpop.eup %6678 }
 0x39d   :  { %3504 = vrot.lane.b32.xlu1 %v6679_v3, %s6764_s27 }
 0x40f   :  { %v3505_v52 = vpop.permute.xlu1 %3504 }
 0x410   :  { %v3507_v53 = vmul.f32 %v3505_v52, %v3486_v23 }
 0x412   :  { %3509 = vrot.lane.b32.xlu0 %v3507_v53, %s6765_s28 }
 0x484   :  { %v7999_v46 = vpop.permute.xlu0 %3509 }
 0x485   :  { %v3511_v4 = vsel %vm1018_vm2, %v7999_v46, 0 }
 0x486   :  { %v3582_v47 = vand.u32 4294901760, %v3511_v4 }
 0x488   :  { %v3583_v43 = vsub.f32 %v3511_v4, %v3582_v47  ;;  %6485 = vmatmul.mubr.f32.vlgmr.msra.gmra.mxu1 %v3582_v47 }
 0x489   :  { %6499 = vmatpush3.msra.mxu1 %v3538_v60  ;;  %6506 = vmatprep.mubr.msk.f32.mxu1 %vm6768_vm3, %v8561_v11 }
 0x48a   :  { %v3584_v27 = vand.u32 4294901760, %v3583_v43  ;;  %6500 = vmatprep.subr.mxu1 %v8561_v11 }
 0x48b   :  { %6501 = vmatpush3.msra.mxu1 %v7963_v61 }
 0x48c   :  { %v3585_v10 = vsub.f32 %v3583_v43, %v3584_v27  ;;  %6502 = vmatprep.subr.mxu1 %v8561_v11 }
 0x48d   :  { %6503 = vmatpush3.msra.mxu1 %v7965_v62 }
 0x48e   :  { %6504 = vmatprep.subr.mxu1 %v8561_v11  ;;  %v3586_v49 = vand.u32 4294901760, %v3585_v10 }
 0x48f   :  { %6505 = vmatpush3.msra.mxu1 %v3547_v42 }
 0x490   :  { %6507 = vmatmul.mubr.f32.vlgmr.msra.gmra.mxu1 %v3584_v27  ;;  %6520 = vmatprep.subr.mxu1 %v8561_v11 }
 0x491   :  { %6474 = vmatmul.mubr.f32.vlgmr.msra.gmra.mxu0 %v3586_v49  ;;  %6521 = vmatpush3.msra.mxu1 %v3538_v60  ;;  %v991_v60 = vld [vmem:[#allocation5 + $0x98] sm:$0xff] }
 0x492   :  { %6488 = vmatpush3.msra.mxu0 %v7967_v0  ;;  %6522 = vmatprep.subr.mxu1 %v8561_v11  ;;  %v4049_v0 = vand.u32 4294901760, %v991_v60 }
 0x493   :  { %6489 = vmatprep.subr.mxu0 %v8561_v11  ;;  %6523 = vmatpush3.msra.mxu1 %v7963_v61  ;;  %v990_v61 = vld [vmem:[#allocation5 + $0x90] sm:$0xff] }
 0x494   :  { %6490 = vmatpush3.msra.mxu0 %v7970_v2  ;;  %6524 = vmatprep.subr.mxu1 %v8561_v11  ;;  %v8053_v2 = vand.u32 4294901760, %v990_v61 }
 0x495   :  { %6491 = vmatprep.subr.mxu0 %v8561_v11  ;;  %6525 = vmatpush3.msra.mxu1 %v7965_v62  ;;  %v989_v62 = vld [vmem:[#allocation5 + $0x88] sm:$0xff] }
 0x496   :  { %6492 = vmatpush3.msra.mxu0 %v7973_v6  ;;  %6526 = vmatprep.subr.mxu1 %v8561_v11  ;;  %v8055_v6 = vand.u32 4294901760, %v989_v62 }
 0x497   :  { %6493 = vmatprep.subr.mxu0 %v8561_v11  ;;  %6495 = vmatprep.mubr.msk.f32.mxu0 %vm6768_vm3, %v8561_v11 }
 0x498   :  { %6494 = vmatpush3.msra.mxu0 %v3639_v44  ;;  %6527 = vmatpush3.msra.mxu1 %v3547_v42 }
 0x499   :  { %6528 = vmatprep.mubr.msk.f32.mxu1 %vm6768_vm3, %v8561_v11  ;;  %6496 = vmatmul.mubr.f32.vlgmr.msra.gmra.mxu0 %v3583_v43 }
 0x49a   :  { %6509 = vmatprep.subr.mxu0 %v8561_v11  ;;  %6529 = vmatmul.mubr.f32.vlgmr.msra.gmra.mxu1 %v3582_v47 }
 0x49b   :  { %6510 = vmatpush3.msra.mxu0 %v3619_v7  ;;  %6517 = vmatprep.mubr.msk.f32.mxu0 %vm6768_vm3, %v8561_v11  ;;  %v8057_v7 = vsub.f32 %v991_v60, %v4049_v0 }
 0x49c   :  { %6511 = vmatprep.subr.mxu0 %v8561_v11  ;;  %6542 = vmatprep.subr.mxu1 %v8561_v11 }
 0x49d   :  { %6512 = vmatpush3.msra.mxu0 %v3626_v13  ;;  %6550 = vmatprep.mubr.msk.f32.mxu1 %vm6768_vm3, %v8561_v11  ;;  %v8060_v13 = vsub.f32 %v990_v61, %v8053_v2  ;;  %v4130_v38 = vand.u32 4294901760, %v8057_v7 }
 0x49e   :  { %6513 = vmatprep.subr.mxu0 %v8561_v11 }
 0x49f   :  { %6514 = vmatpush3.msra.mxu0 %v3633_v30  ;;  %v8063_v30 = vsub.f32 %v989_v62, %v8055_v6  ;;  %v4137_v25 = vand.u32 4294901760, %v8060_v13  ;;  %v4131_v8 = vsub.f32 %v8057_v7, %v4130_v38 }
 0x4a0   :  { %6515 = vmatprep.subr.mxu0 %v8561_v11 }
 0x4a1   :  { %6516 = vmatpush3.msra.mxu0 %v3640_v29  ;;  %v4144_v63 = vand.u32 4294901760, %v8063_v30  ;;  %v4138_v57 = vsub.f32 %v8060_v13, %v4137_v25  ;;  %v4132_v14 = vand.u32 4294901760, %v4131_v8  ;;  %v988_v29 = vld [vmem:[#allocation5 + $0x80] sm:$0xff] }
 0x4a2   :  { %6518 = vmatmul.mubr.f32.vlgmr.msra.gmra.mxu0 %v3582_v47  ;;  %6531 = vmatprep.subr.mxu0 %v8561_v11  ;;  %v4058_v45 = vand.u32 4294901760, %v988_v29 }
 0x4a3   :  { %6539 = vmatprep.mubr.msk.f32.mxu0 %vm6768_vm3, %v8561_v11  ;;  %6532 = vmatpush3.msra.mxu0 %v4049_v0  ;;  %v4145_v3 = vsub.f32 %v8063_v30, %v4144_v63  ;;  %v4139_v1 = vand.u32 4294901760, %v4138_v57 }
 0x4a4   :  { %6533 = vmatprep.subr.mxu0 %v8561_v11  ;;  %6543 = vmatpush3.msra.mxu1 %v4132_v14  ;;  %v4150_v51 = vsub.f32 %v988_v29, %v4058_v45 }
 0x4a5   :  { %6534 = vmatpush3.msra.mxu0 %v8053_v2  ;;  %v4146_v44 = vand.u32 4294901760, %v4145_v3  ;;  %6544 = vmatprep.subr.mxu1 %v8561_v11 }
 0x4a6   :  { %6535 = vmatprep.subr.mxu0 %v8561_v11  ;;  %6545 = vmatpush3.msra.mxu1 %v4139_v1  ;;  %v4151_v52 = vand.u32 4294901760, %v4150_v51 }
 0x4a7   :  { %6536 = vmatpush3.msra.mxu0 %v8055_v6  ;;  %6546 = vmatprep.subr.mxu1 %v8561_v11 }
 0x4a8   :  { %6537 = vmatprep.subr.mxu0 %v8561_v11  ;;  %6547 = vmatpush3.msra.mxu1 %v4146_v44  ;;  %v4152_v53 = vsub.f32 %v4150_v51, %v4151_v52 }
 0x4a9   :  { %6548 = vmatprep.subr.mxu1 %v8561_v11  ;;  %6538 = vmatpush3.msra.mxu0 %v4058_v45 }
 0x4aa   :  { %6553 = vmatprep.subr.mxu0 %v8561_v11  ;;  %v4153_v4 = vand.u32 4294901760, %v4152_v53 }
 0x4ac   :  { %6549 = vmatpush3.msra.mxu1 %v4153_v4  ;;  %v997_v4 = vld [vmem:[#allocation5 + $0xc0] sm:$0xff] }
 0x4ad   :  { %6564 = vmatprep.subr.mxu1 %v8561_v11 }
 0x548   :  { %v3679_v48 = vpop.f32.mrf.mxu1 }
 0x54a   :  { %v6486_v40 = vpop.f32.mrf.mxu1 }
 0x550   :  { %v3836_v50 = vpop.f32.mrf.mxu1 }
 0x551   :  { %v3588_v41 = vpop.f32.mrf.mxu0 }
 0x552   :  { %v6508_v28 = vpop.f32.mrf.mxu1  ;;  %v3589_v54 = vadd.f32 %v3588_v41, %v7937_v34 }
 0x553   :  { %v6475_v31 = vpop.f32.mrf.mxu0 }
 0x554   :  { %v3680_v36 = vadd.f32 %v3679_v48, %v3589_v54 }
 0x559   :  { %v3759_v15 = vpop.f32.mrf.mxu0 }
 0x55a   :  { %v3994_v16 = vpop.f32.mrf.mxu1  ;;  %v3760_v37 = vadd.f32 %v3759_v15, %v3680_v36 }
 0x55b   :  { %v6497_v17 = vpop.f32.mrf.mxu0 }
 0x55c   :  { %v6530_v24 = vpop.f32.mrf.mxu1  ;;  %v3837_v9 = vadd.f32 %v3836_v50, %v3760_v37 }
 0x562   :  { %v3919_v18 = vpop.f32.mrf.mxu0 }
 0x563   :  { %v3920_v12 = vadd.f32 %v3919_v18, %v3837_v9 }
 0x564   :  { %v6519_v33 = vpop.f32.mrf.mxu0 }
 0x565   :  { %v3995_v23 = vadd.f32 %v3994_v16, %v3920_v12 }
 0x567   :  { %6680 = vtanh.f32 %v3995_v23 }
 0x574   :  { %v6681_v58 = vpop.eup %6680 }
 0x575   :  { %v3999_v35 = vmul.f32 0.5, %v6681_v58 }
 0x577   :  { %v4000_v39 = vadd.f32 0.5, %v3999_v35 }
 0x579   :  { %v4001_v20 = vsel %vm7952_vm6, %v6681_v58, %v4000_v39 }
 0x57a   :  { %4004 = vrot.lane.b32.xlu1 %v4001_v20, %s6764_s27  ;;  %v4002_v22 = vmul.f32 %v4001_v20, %v7871_v59 }
 0x5ec   :  { %v4005_v34 = vpop.permute.xlu1 %4004 }
 0x5ed   :  { %v4007_v21 = vmul.f32 %v4005_v34, %v4001_v20 }
 0x5ef   :  { %4009 = vrot.lane.b32.xlu0 %v4007_v21, %s6765_s28 }
 0x661   :  { %v4010_v26 = vpop.permute.xlu0 %4009 }
 0x662   :  { %v8050_v56 = vadd.f32 %v4010_v26, %v4002_v22 }
 0x664   :  { %6682 = vtanh.f32 %v8050_v56 }
 0x671   :  { %v6683_v42 = vpop.eup %6682 }
 0x672   :  { %4015 = vrot.lane.b32.xlu1 %v6683_v42, %s6764_s27 }
 0x6e4   :  { %v4016_v47 = vpop.permute.xlu1 %4015 }
 0x6e5   :  { %v8088_v43 = vmul.f32 %v4016_v47, %v4001_v20  ;;  %v4572_v47 = vand.u32 4294901760, %v997_v4 }
 0x6e7   :  { %4020 = vrot.lane.b32.xlu0 %v8088_v43, %s6765_s28 }
 0x6eb   :  { %4513 = vrot.lane.b32.xlu0 %v7871_v59, %s6763_s26 }
 0x759   :  { %v4021_v27 = vpop.permute.xlu0 %4020 }
 0x75a   :  { %v4022_v10 = vsel %vm1018_vm2, %v4021_v27, 0  ;;  %v4664_v27 = vsub.f32 %v997_v4, %v4572_v47 }
 0x75b   :  { %v4093_v49 = vand.u32 4294901760, %v4022_v10 }
 0x75d   :  { %v4094_v48 = vsub.f32 %v4022_v10, %v4093_v49  ;;  %6551 = vmatmul.mubr.f32.vlgmr.msra.gmra.mxu1 %v4093_v49  ;;  %v4514_v61 = vpop.permute.xlu0 %4513  ;;  %v4665_v10 = vand.u32 4294901760, %v4664_v27 }
 0x75e   :  { %6565 = vmatpush3.msra.mxu1 %v4049_v0  ;;  %6572 = vmatprep.mubr.msk.f32.mxu1 %vm6768_vm3, %v8561_v11 }
 0x75f   :  { %v4095_v40 = vand.u32 4294901760, %v4094_v48  ;;  %6566 = vmatprep.subr.mxu1 %v8561_v11 }
 0x760   :  { %6567 = vmatpush3.msra.mxu1 %v8053_v2 }
 0x761   :  { %v4096_v50 = vsub.f32 %v4094_v48, %v4095_v40  ;;  %6568 = vmatprep.subr.mxu1 %v8561_v11 }
 0x762   :  { %6569 = vmatpush3.msra.mxu1 %v8055_v6 }
 0x763   :  { %v4097_v41 = vand.u32 4294901760, %v4096_v50  ;;  %6570 = vmatprep.subr.mxu1 %v8561_v11 }
 0x764   :  { %6571 = vmatpush3.msra.mxu1 %v4058_v45 }
 0x765   :  { %6573 = vmatmul.mubr.f32.vlgmr.msra.gmra.mxu1 %v4095_v40  ;;  %6586 = vmatprep.subr.mxu1 %v8561_v11 }
 0x766   :  { %6540 = vmatmul.mubr.f32.vlgmr.msra.gmra.mxu0 %v4097_v41  ;;  %6587 = vmatpush3.msra.mxu1 %v4049_v0 }
 0x767   :  { %6554 = vmatpush3.msra.mxu0 %v8057_v7  ;;  %6588 = vmatprep.subr.mxu1 %v8561_v11  ;;  %v999_v7 = vld [vmem:[#allocation5 + $0xd0] sm:$0xff] }
 0x768   :  { %6555 = vmatprep.subr.mxu0 %v8561_v11  ;;  %6589 = vmatpush3.msra.mxu1 %v8053_v2 }
 0x769   :  { %6556 = vmatpush3.msra.mxu0 %v8060_v13  ;;  %6590 = vmatprep.subr.mxu1 %v8561_v11  ;;  %v998_v13 = vld [vmem:[#allocation5 + $0xc8] sm:$0xff] }
 0x76a   :  { %6557 = vmatprep.subr.mxu0 %v8561_v11  ;;  %6591 = vmatpush3.msra.mxu1 %v8055_v6  ;;  %v1000_v6 = vld [vmem:[#allocation5 + $0xd8] sm:$0xff] }
 0x76b   :  { %6558 = vmatpush3.msra.mxu0 %v8063_v30  ;;  %6592 = vmatprep.subr.mxu1 %v8561_v11  ;;  %v4563_v30 = vand.u32 4294901760, %v1000_v6 }
 0x76c   :  { %6559 = vmatprep.subr.mxu0 %v8561_v11  ;;  %6561 = vmatprep.mubr.msk.f32.mxu0 %vm6768_vm3, %v8561_v11 }
 0x76d   :  { %6560 = vmatpush3.msra.mxu0 %v4150_v51  ;;  %6593 = vmatpush3.msra.mxu1 %v4058_v45 }
 0x76e   :  { %6594 = vmatprep.mubr.msk.f32.mxu1 %vm6768_vm3, %v8561_v11  ;;  %6562 = vmatmul.mubr.f32.vlgmr.msra.gmra.mxu0 %v4094_v48 }
 0x76f   :  { %6575 = vmatprep.subr.mxu0 %v8561_v11  ;;  %6595 = vmatmul.mubr.f32.vlgmr.msra.gmra.mxu1 %v4093_v49 }
 0x770   :  { %6576 = vmatpush3.msra.mxu0 %v4130_v38  ;;  %6583 = vmatprep.mubr.msk.f32.mxu0 %vm6768_vm3, %v8561_v11  ;;  %v8144_v38 = vand.u32 4294901760, %v999_v7 }
 0x771   :  { %6577 = vmatprep.subr.mxu0 %v8561_v11  ;;  %6608 = vmatprep.subr.mxu1 %v8561_v11 }
 0x772   :  { %6578 = vmatpush3.msra.mxu0 %v4137_v25  ;;  %6616 = vmatprep.mubr.msk.f32.mxu1 %vm6768_vm3, %v8561_v11  ;;  %v8146_v25 = vand.u32 4294901760, %v998_v13  ;;  %v8151_v8 = vsub.f32 %v999_v7, %v8144_v38 }
 0x773   :  { %6579 = vmatprep.subr.mxu0 %v8561_v11 }
 0x774   :  { %6580 = vmatpush3.msra.mxu0 %v4144_v63  ;;  %v8148_v63 = vsub.f32 %v1000_v6, %v4563_v30  ;;  %v8154_v57 = vsub.f32 %v998_v13, %v8146_v25  ;;  %v4651_v14 = vand.u32 4294901760, %v8151_v8 }
 0x775   :  { %6581 = vmatprep.subr.mxu0 %v8561_v11 }
 0x776   :  { %6582 = vmatpush3.msra.mxu0 %v4151_v52  ;;  %v4644_v3 = vand.u32 4294901760, %v8148_v63  ;;  %v4658_v1 = vand.u32 4294901760, %v8154_v57  ;;  %v4652_v44 = vsub.f32 %v8151_v8, %v4651_v14 }
 0x777   :  { %6584 = vmatmul.mubr.f32.vlgmr.msra.gmra.mxu0 %v4093_v49  ;;  %6597 = vmatprep.subr.mxu0 %v8561_v11  ;;  %v4666_v49 = vsub.f32 %v4664_v27, %v4665_v10 }
 0x778   :  { %6605 = vmatprep.mubr.msk.f32.mxu0 %vm6768_vm3, %v8561_v11  ;;  %6598 = vmatpush3.msra.mxu0 %v4563_v30  ;;  %v4645_v42 = vsub.f32 %v8148_v63, %v4644_v3  ;;  %v4659_v29 = vsub.f32 %v8154_v57, %v4658_v1  ;;  %v4653_v51 = vand.u32 4294901760, %v4652_v44  ;;  %v5078_v44 = vld [vmem:[%s8421_s6 + $0x10] sm:$0xff] }
 0x779   :  { %6599 = vmatprep.subr.mxu0 %v8561_v11  ;;  %v4667_v48 = vand.u32 4294901760, %v4666_v49 }
 0x77a   :  { %6600 = vmatpush3.msra.mxu0 %v8144_v38  ;;  %v4646_v45 = vand.u32 4294901760, %v4645_v42  ;;  %v4660_v53 = vand.u32 4294901760, %v4659_v29  ;;  %v5079_v42 = vld [vmem:[%s8421_s6 + $0x18] sm:$0xff] }
 0x77b   :  { %6601 = vmatprep.subr.mxu0 %v8561_v11 }
 0x77c   :  { %6602 = vmatpush3.msra.mxu0 %v8146_v25  ;;  %6609 = vmatpush3.msra.mxu1 %v4646_v45  ;;  %v8260_v45 = vand.u32 4294901760, %v5079_v42 }
 0x77d   :  { %6603 = vmatprep.subr.mxu0 %v8561_v11  ;;  %6610 = vmatprep.subr.mxu1 %v8561_v11 }
 0x77e   :  { %6611 = vmatpush3.msra.mxu1 %v4653_v51  ;;  %6604 = vmatpush3.msra.mxu0 %v4572_v47  ;;  %v8262_v51 = vand.u32 4294901760, %v5078_v44 }
 0x77f   :  { %6612 = vmatprep.subr.mxu1 %v8561_v11  ;;  %6619 = vmatprep.subr.mxu0 %v8561_v11 }
 0x780   :  { %6613 = vmatpush3.msra.mxu1 %v4660_v53 }
 0x781   :  { %6614 = vmatprep.subr.mxu1 %v8561_v11 }
 0x782   :  { %6615 = vmatpush3.msra.mxu1 %v4667_v48 }
 0x783   :  { %6630 = vmatprep.subr.mxu1 %v8561_v11 }
 0x81d   :  { %v4190_v28 = vpop.f32.mrf.mxu1 }
 0x81f   :  { %v6552_v31 = vpop.f32.mrf.mxu1 }
 0x825   :  { %v4347_v54 = vpop.f32.mrf.mxu1 }
 0x826   :  { %v4099_v15 = vpop.f32.mrf.mxu0 }
 0x827   :  { %v6574_v16 = vpop.f32.mrf.mxu1  ;;  %v4100_v17 = vadd.f32 %v4099_v15, %v7942_v19 }
 0x828   :  { %v6541_v36 = vpop.f32.mrf.mxu0 }
 0x829   :  { %v4191_v9 = vadd.f32 %v4190_v28, %v4100_v17 }
 0x82e   :  { %v4270_v24 = vpop.f32.mrf.mxu0 }
 0x82f   :  { %v4505_v37 = vpop.f32.mrf.mxu1  ;;  %v4271_v33 = vadd.f32 %v4270_v24, %v4191_v9 }
 0x830   :  { %v6563_v18 = vpop.f32.mrf.mxu0 }
 0x831   :  { %v6596_v12 = vpop.f32.mrf.mxu1  ;;  %v4348_v23 = vadd.f32 %v4347_v54, %v4271_v33 }
 0x837   :  { %v4430_v58 = vpop.f32.mrf.mxu0 }
 0x838   :  { %v4431_v35 = vadd.f32 %v4430_v58, %v4348_v23 }
 0x839   :  { %v6585_v39 = vpop.f32.mrf.mxu0 }
 0x83a   :  { %v4506_v20 = vadd.f32 %v4505_v37, %v4431_v35 }
 0x83c   :  { %6684 = vtanh.f32 %v4506_v20 }
 0x849   :  { %v6685_v34 = vpop.eup %6684 }
 0x84a   :  { %v4510_v21 = vmul.f32 0.5, %v6685_v34 }
 0x84c   :  { %v4511_v22 = vadd.f32 0.5, %v4510_v21 }
 0x84e   :  { %v4512_v26 = vsel %vm7952_vm6, %v6685_v34, %v4511_v22 }
 0x84f   :  { %4518 = vrot.lane.b32.xlu1 %v4512_v26, %s6764_s27  ;;  %v4516_v62 = vmul.f32 %v4514_v61, %v4512_v26 }
 0x8c1   :  { %v4519_v19 = vpop.permute.xlu1 %4518 }
 0x8c2   :  { %v4521_v60 = vmul.f32 %v4519_v19, %v4512_v26 }
 0x8c4   :  { %4523 = vrot.lane.b32.xlu1 %v4521_v60, %s6765_s28 }
 0x936   :  { %v4524_v0 = vpop.permute.xlu1 %4523 }
 0x937   :  { %v8141_v2 = vadd.f32 %v4524_v0, %v4516_v62 }
 0x939   :  { %6686 = vtanh.f32 %v8141_v2 }
 0x946   :  { %v6687_v52 = vpop.eup %6686 }
 0x947   :  { %4529 = vrot.lane.b32.xlu0 %v6687_v52, %s6764_s27 }
 0x9b9   :  { %v4530_v40 = vpop.permute.xlu0 %4529 }
 0x9ba   :  { %v8179_v50 = vmul.f32 %v4530_v40, %v4512_v26 }
 0x9bc   :  { %4534 = vrot.lane.b32.xlu1 %v8179_v50, %s6765_s28 }
 0x9c0   :  { %5027 = vrot.lane.b32.xlu1 %v7871_v59, %s6764_s27 }
 0xa2e   :  { %v4535_v41 = vpop.permute.xlu1 %4534 }
 0xa2f   :  { %v4536_v28 = vsel %vm1018_vm2, %v4535_v41, 0 }
 0xa30   :  { %v4607_v31 = vand.u32 4294901760, %v4536_v28 }
 0xa32   :  { %v4608_v54 = vsub.f32 %v4536_v28, %v4607_v31  ;;  %6617 = vmatmul.mubr.f32.vlgmr.msra.gmra.mxu1 %v4607_v31  ;;  %v5028_v7 = vpop.permute.xlu1 %5027 }
 0xa33   :  { %6631 = vmatpush3.msra.mxu1 %v4563_v30  ;;  %6638 = vmatprep.mubr.msk.f32.mxu1 %vm6768_vm3, %v8561_v11 }
 0xa34   :  { %v4609_v15 = vand.u32 4294901760, %v4608_v54  ;;  %6632 = vmatprep.subr.mxu1 %v8561_v11 }
 0xa35   :  { %6633 = vmatpush3.msra.mxu1 %v8144_v38 }
 0xa36   :  { %v4610_v16 = vsub.f32 %v4608_v54, %v4609_v15  ;;  %6634 = vmatprep.subr.mxu1 %v8561_v11 }
 0xa37   :  { %6635 = vmatpush3.msra.mxu1 %v8146_v25 }
 0xa38   :  { %v4611_v59 = vand.u32 4294901760, %v4610_v16  ;;  %6636 = vmatprep.subr.mxu1 %v8561_v11 }
 0xa39   :  { %6637 = vmatpush3.msra.mxu1 %v4572_v47 }
 0xa3a   :  { %6639 = vmatmul.mubr.f32.vlgmr.msra.gmra.mxu1 %v4609_v15  ;;  %6652 = vmatprep.subr.mxu1 %v8561_v11 }
 0xa3b   :  { %6606 = vmatmul.mubr.f32.vlgmr.msra.gmra.mxu0 %v4611_v59  ;;  %6653 = vmatpush3.msra.mxu1 %v4563_v30 }
 0xa3c   :  { %6620 = vmatpush3.msra.mxu0 %v8148_v63  ;;  %6654 = vmatprep.subr.mxu1 %v8561_v11  ;;  %v5081_v63 = vld [vmem:[%s8421_s6 + $0x28] sm:$0xff] }
 0xa3d   :  { %6621 = vmatprep.subr.mxu0 %v8561_v11  ;;  %6655 = vmatpush3.msra.mxu1 %v8144_v38 }
 0xa3e   :  { %6622 = vmatpush3.msra.mxu0 %v8151_v8  ;;  %6656 = vmatprep.subr.mxu1 %v8561_v11 }
 0xa3f   :  { %6623 = vmatprep.subr.mxu0 %v8561_v11  ;;  %6657 = vmatpush3.msra.mxu1 %v8146_v25  ;;  %v5082_v25 = vld [vmem:[%s8421_s6 + $0x30] sm:$0xff] }
 0xa40   :  { %6624 = vmatpush3.msra.mxu0 %v8154_v57  ;;  %6658 = vmatprep.subr.mxu1 %v8561_v11  ;;  %v8242_v57 = vand.u32 4294901760, %v5083_v32 }
 0xa41   :  { %6625 = vmatprep.subr.mxu0 %v8561_v11  ;;  %6627 = vmatprep.mubr.msk.f32.mxu0 %vm6768_vm3, %v8561_v11 }
 0xa42   :  { %6626 = vmatpush3.msra.mxu0 %v4664_v27  ;;  %6659 = vmatpush3.msra.mxu1 %v4572_v47  ;;  %v8265_v52 = vsub.f32 %v5083_v32, %v8242_v57  ;;  %v8278_v27 = vsub.f32 %v5079_v42, %v8260_v45 }
 0xa43   :  { %6660 = vmatprep.mubr.msk.f32.mxu1 %vm6768_vm3, %v8561_v11  ;;  %6628 = vmatmul.mubr.f32.vlgmr.msra.gmra.mxu0 %v4608_v54 }
 0xa44   :  { %6641 = vmatprep.subr.mxu0 %v8561_v11  ;;  %6661 = vmatmul.mubr.f32.vlgmr.msra.gmra.mxu1 %v4607_v31  ;;  %v5211_v49 = vand.u32 4294901760, %v8265_v52  ;;  %v5235_v28 = vand.u32 4294901760, %v8278_v27 }
 0xa45   :  { %6642 = vmatpush3.msra.mxu0 %v4644_v3  ;;  %6649 = vmatprep.mubr.msk.f32.mxu0 %vm6768_vm3, %v8561_v11  ;;  %v8244_v3 = vand.u32 4294901760, %v5082_v25 }
 0xa46   :  { %6643 = vmatprep.subr.mxu0 %v8561_v11  ;;  %5289 = vmatprep.mubr.f32.mxu1 %v8561_v11  ;;  %v5212_v54 = vsub.f32 %v8265_v52, %v5211_v49  ;;  %v5236_v59 = vsub.f32 %v8278_v27, %v5235_v28 }
 0xa47   :  { %6644 = vmatpush3.msra.mxu0 %v4651_v14  ;;  %v8246_v14 = vand.u32 4294901760, %v5081_v63  ;;  %v8268_v53 = vsub.f32 %v5082_v25, %v8244_v3 }
 0xa48   :  { %6645 = vmatprep.subr.mxu0 %v8561_v11 }
 0xa49   :  { %6646 = vmatpush3.msra.mxu0 %v4658_v1  ;;  %v5080_v1 = vld [vmem:[%s8421_s6 + $0x20] sm:$0xff]  ;;  %v8271_v4 = vsub.f32 %v5081_v63, %v8246_v14  ;;  %v5217_v48 = vand.u32 4294901760, %v8268_v53 }
 0xa4a   :  { %6647 = vmatprep.subr.mxu0 %v8561_v11  ;;  %v8258_v29 = vand.u32 4294901760, %v5080_v1 }
 0xa4b   :  { %6648 = vmatpush3.msra.mxu0 %v4665_v10  ;;  %v8281_v10 = vsub.f32 %v5078_v44, %v8262_v51  ;;  %v5223_v40 = vand.u32 4294901760, %v8271_v4  ;;  %v5218_v15 = vsub.f32 %v8268_v53, %v5217_v48 }
 0xa4c   :  { %6650 = vmatmul.mubr.f32.vlgmr.msra.gmra.mxu0 %v4607_v31  ;;  %5126 = vmatprep.subr.mxu0 %v8242_v57  ;;  %v8275_v47 = vsub.f32 %v5080_v1, %v8258_v29 }
 0xa4d   :  { %5173 = vmatprep.mubr.f32.mxu0 %v8561_v11  ;;  %5128 = vmatpush1.msra.mxu0 %v8244_v3  ;;  %v5241_v31 = vand.u32 4294901760, %v8281_v10 }
 0xa4e   :  { %5130 = vmatprep.subr.mxu0 %v8246_v14  ;;  %v5229_v41 = vand.u32 4294901760, %v8275_v47 }
 0xa4f   :  { %5132 = vmatpush1.msra.mxu0 %v8258_v29 }
 0xa50   :  { %5134 = vmatprep.subr.mxu0 %v8260_v45  ;;  %v5230_v16 = vsub.f32 %v8275_v47, %v5229_v41 }
 0xa51   :  { %5136 = vmatpush1.msra.mxu0 %v8262_v51 }
 0xaf2   :  { %v4704_v36 = vpop.f32.mrf.mxu1 }
 0xaf4   :  { %v6618_v17 = vpop.f32.mrf.mxu1 }
 0xaf5   :  { %v5213_v17 = vand.u32 4294901760, %v5212_v54 }
 0xaf7   :  { %5214 = vmatprep.subr.mxu1 %v5213_v17 }
 0xafa   :  { %v4861_v24 = vpop.f32.mrf.mxu1 }
 0xafb   :  { %v4613_v37 = vpop.f32.mrf.mxu0 }
 0xafc   :  { %v6640_v9 = vpop.f32.mrf.mxu1  ;;  %v4614_v12 = vadd.f32 %v4613_v37, %v7947_v55 }
 0xafd   :  { %v6607_v18 = vpop.f32.mrf.mxu0  ;;  %v5231_v9 = vand.u32 4294901760, %v5230_v16 }
 0xafe   :  { %v4705_v58 = vadd.f32 %v4704_v36, %v4614_v12  ;;  %v5242_v36 = vsub.f32 %v8281_v10, %v5241_v31  ;;  %v5237_v18 = vand.u32 4294901760, %v5236_v59 }
 0xb00   :  { %v5243_v12 = vand.u32 4294901760, %v5242_v36 }
 0xb03   :  { %v4784_v33 = vpop.f32.mrf.mxu0 }
 0xb04   :  { %v5019_v23 = vpop.f32.mrf.mxu1  ;;  %v4785_v20 = vadd.f32 %v4784_v33, %v4705_v58  ;;  %v5077_v33 = vld [vmem:[%s8421_s6 + $0x8] sm:$0xff] }
 0xb05   :  { %v6629_v35 = vpop.f32.mrf.mxu0 }
 0xb06   :  { %v6662_v39 = vpop.f32.mrf.mxu1  ;;  %v4862_v34 = vadd.f32 %v4861_v24, %v4785_v20  ;;  %v5219_v24 = vand.u32 4294901760, %v5218_v15 }
 0xb08   :  { %5220 = vmatpush1.msra.mxu1 %v5219_v24 }
 0xb0c   :  { %v4944_v21 = vpop.f32.mrf.mxu0 }
 0xb0d   :  { %v4945_v22 = vadd.f32 %v4944_v21, %v4862_v34 }
 0xb0e   :  { %v6651_v26 = vpop.f32.mrf.mxu0 }
 0xb0f   :  { %v5020_v19 = vadd.f32 %v5019_v23, %v4945_v22  ;;  %v8320_v23 = vand.u32 4294901760, %v5077_v33 }
 0xb11   :  { %6688 = vtanh.f32 %v5020_v19  ;;  %v8328_v35 = vsub.f32 %v5077_v33, %v8320_v23  ;;  %5138 = vmatprep.subr.mxu0 %v8320_v23 }
 0xb13   :  { %v5247_v20 = vand.u32 4294901760, %v8328_v35 }
 0xb15   :  { %v5248_v21 = vsub.f32 %v8328_v35, %v5247_v20 }
 0xb17   :  { %v5249_v26 = vand.u32 4294901760, %v5248_v21 }
 0xb1e   :  { %v6689_v60 = vpop.eup %6688 }
 0xb1f   :  { %v5024_v61 = vmul.f32 0.5, %v6689_v60 }
 0xb21   :  { %v5025_v62 = vadd.f32 0.5, %v5024_v61 }
 0xb23   :  { %v8226_v0 = vsel %vm7952_vm6, %v6689_v60, %v5025_v62 }
 0xb24   :  { %5032 = vrot.lane.b32.xlu0 %v8226_v0, %s6764_s27  ;;  %v5030_v13 = vmul.f32 %v5028_v7, %v8226_v0 }
 0xb96   :  { %v5033_v55 = vpop.permute.xlu0 %5032 }
 0xb97   :  { %v5035_v6 = vmul.f32 %v5033_v55, %v8226_v0 }
 0xb99   :  { %5037 = vrot.lane.b32.xlu0 %v5035_v6, %s6765_s28 }
 0xc0b   :  { %v5038_v30 = vpop.permute.xlu0 %5037 }
 0xc0c   :  { %v5040_v38 = vadd.f32 %v5038_v30, %v5030_v13 }
 0xc0e   :  { %6690 = vtanh.f32 %v5040_v38 }
 0xc1b   :  { %v6691_v8 = vpop.eup %6690 }
 0xc1c   :  { %5043 = vrot.lane.b32.xlu1 %v6691_v8, %s6764_s27 }
 0xc20   :  { %5048 = vrot.lane.b32.xlu1 %v8088_v43, %s6764_s27  ;;  %v5224_v43 = vsub.f32 %v8271_v4, %v5223_v40 }
 0xc22   :  { %v5225_v37 = vand.u32 4294901760, %v5224_v43 }
 0xc24   :  { %5051 = vrot.lane.b32.xlu1 %v8179_v50, %s6763_s26  ;;  %5226 = vmatprep.subr.mxu1 %v5225_v37  ;;  %v5076_v50 = vld [vmem:[%s8421_s6] sm:$0xff] }
 0xc25   :  { %5232 = vmatpush1.msra.mxu1 %v5231_v9  ;;  %v8325_v58 = vand.u32 4294901760, %v5076_v50 }
 0xc26   :  { %5238 = vmatprep.subr.mxu1 %v5237_v18 }
 0xc27   :  { %5244 = vmatpush1.msra.mxu1 %v5243_v12  ;;  %v8332_v39 = vsub.f32 %v5076_v50, %v8325_v58  ;;  %5140 = vmatpush1.msra.mxu0 %v8325_v58 }
 0xc28   :  { %5069 = vrot.lane.b32.xlu1 %v5040_v38, %s6764_s27  ;;  %5323 = vmatprep.subr.mxu0 %v8265_v52 }
 0xc29   :  { %v5253_v34 = vand.u32 4294901760, %v8332_v39  ;;  %5250 = vmatprep.subr.mxu1 %v5249_v26 }
 0xc2b   :  { %v5254_v22 = vsub.f32 %v8332_v39, %v5253_v34 }
 0xc2d   :  { %v5255_v19 = vand.u32 4294901760, %v5254_v22 }
 0xc2f   :  { %5256 = vmatpush1.msra.mxu1 %v5255_v19 }
 0xc30   :  { %5411 = vmatprep.subr.mxu1 %v8242_v57 }
 0xc8e   :  { %v5044_v60 = vpop.permute.xlu1 %5043 }
 0xc8f   :  { %v5046_v61 = vmul.f32 %v5044_v60, %v8226_v0 }
 0xc91   :  { %5097 = vrot.lane.b32.xlu0 %v5046_v61, %s6765_s28 }
 0xc92   :  { %v5049_v62 = vpop.permute.xlu1 %5048 }
 0xc93   :  { %v5054_v55 = vsel %vm1018_vm2, %v7999_v46, %v5049_v62 }
 0xc95   :  { %5061 = vrot.lane.b32.xlu0 %v7960_v5, %s6763_s26 }
 0xc96   :  { %v5052_v6 = vpop.permute.xlu1 %5051 }
 0xc97   :  { %v5056_v7 = vsel %vm5055_vm7, %v5054_v55, %v5052_v6 }
 0xc98   :  { %v5058_v13 = vsel %vm5057_vm8, %v5056_v7, %v5046_v61 }
 0xc99   :  { %5059 = vst [vmem:[%s8424_s9] sm:$0xff] %v5058_v13  ;;  %5065 = vrot.lane.b32.xlu0 %v8141_v2, %s6765_s28 }
 0xc9a   :  { %v5070_v8 = vpop.permute.xlu1 %5069 }
 0xd03   :  { %v5098_v0 = vpop.permute.xlu0 %5097 }
 0xd04   :  { %v5099_v30 = vsel %vm1018_vm2, %v5098_v0, 0 }
 0xd05   :  { %v5174_v5 = vand.u32 4294901760, %v5099_v30 }
 0xd07   :  { %v5175_v38 = vsub.f32 %v5099_v30, %v5174_v5  ;;  %5291 = vmatmul.mubr.f32.vlgmr.msra.gmra.mxu1 %v5174_v5  ;;  %v5062_v32 = vpop.permute.xlu0 %5061 }
 0xd08   :  { %5413 = vmatpush1.msra.mxu1 %v8244_v3  ;;  %5458 = vmatprep.mubr.f32.mxu1 %v8561_v11  ;;  %v5072_v2 = vsel %vm1018_vm2, %v5062_v32, %v8050_v56 }
 0xd09   :  { %v5176_v46 = vand.u32 4294901760, %v5175_v38  ;;  %5415 = vmatprep.subr.mxu1 %v8246_v14 }
 0xd0a   :  { %5417 = vmatpush1.msra.mxu1 %v8258_v29 }
 0xd0b   :  { %v5177_v25 = vsub.f32 %v5175_v38, %v5176_v46  ;;  %5419 = vmatprep.subr.mxu1 %v8260_v45  ;;  %v5066_v63 = vpop.permute.xlu0 %5065 }
 0xd0c   :  { %5421 = vmatpush1.msra.mxu1 %v8262_v51  ;;  %v5073_v1 = vsel %vm5055_vm7, %v5072_v2, %v5066_v63 }
 0xd0d   :  { %v5178_v42 = vand.u32 4294901760, %v5177_v25  ;;  %v5074_v44 = vsel %vm5057_vm8, %v5073_v1, %v5070_v8  ;;  %5423 = vmatprep.subr.mxu1 %v8320_v23 }
 0xd0e   :  { %5075 = vst [vmem:[%s8425_s10] sm:$0xff] %v5074_v44  ;;  %5425 = vmatpush1.msra.mxu1 %v8325_v58 }
 0xd0f   :  { %5462 = vmatmul.mubr.f32.vlgmr.msra.gmra.mxu1 %v5176_v46  ;;  %5589 = vmatprep.subr.mxu1 %v8242_v57 }
 0xd10   :  { %5179 = vmatmul.mubr.f32.vlgmr.msra.gmra.mxu0 %v5178_v42  ;;  %5591 = vmatpush1.msra.mxu1 %v8244_v3  ;;  %v5084_v3 = vld [vmem:[%s8422_s7] sm:$0x3]  ;;  %s6769_s7 = smov [#allocation7]  }
 0xd11   :  { %5326 = vmatpush1.msra.mxu0 %v8268_v53  ;;  %5593 = vmatprep.subr.mxu1 %v8246_v14  ;;  %s5652_s30 = sshll.u32 %s6769_s7, 4  ;;  %s5653_s30 = int_to_ptr.vmem [resolvable:$true] %s5652_s30 }
 0xd12   :  { %5329 = vmatprep.subr.mxu0 %v8271_v4  ;;  %5595 = vmatpush1.msra.mxu1 %v8258_v29  ;;  %s6732_s11 = scalar_lea.vmem %s5653_s30, 256  ;;  %p6737_p11 = scmp.lt.s32.totalorder %s5653_s30, %s5653_s30 }
 0xd13   :  { %5332 = vmatpush1.msra.mxu0 %v8275_v47  ;;  %5597 = vmatprep.subr.mxu1 %v8260_v45  ;;  %p6733_p10 = scmp.ne.s32.totalorder %s5653_s30, %s6732_s11  ;;  %p6738_p12 = scmp.lt.s32.totalorder %s6732_s11, %s6732_s11 }
 0xd14   :  { %5335 = vmatprep.subr.mxu0 %v8278_v27  ;;  %5599 = vmatpush1.msra.mxu1 %v8262_v51 }
 0xd15   :  { %5338 = vmatpush1.msra.mxu0 %v8281_v10  ;;  %5601 = vmatprep.subr.mxu1 %v8320_v23  ;;  %p6739_p13 = por %p6738_p12, %p6737_p11 }
 0xd16   :  { %5341 = vmatprep.subr.mxu0 %v8328_v35  ;;  %5377 = vmatprep.mubr.f32.mxu0 %v8561_v11 }
 0xd17   :  { %5344 = vmatpush1.msra.mxu0 %v8332_v39  ;;  %5603 = vmatpush1.msra.mxu1 %v8325_v58  ;;  %p6740_p0 = pnand %p6739_p13, %p6733_p10 }
 0xd18   :  { %5636 = vmatprep.mubr.f32.mxu1 %v8561_v11  ;;  %5380 = vmatmul.mubr.f32.vlgmr.msra.gmra.mxu0 %v5175_v38 }
 0xd19   :  { %5495 = vmatprep.subr.mxu0 %v5211_v49  ;;  %5638 = vmatmul.mubr.f32.vlgmr.msra.gmra.mxu1 %v5174_v5 }
 0xd1a   :  { %5499 = vmatpush1.msra.mxu0 %v5217_v48  ;;  %5556 = vmatprep.mubr.f32.mxu0 %v8561_v11  ;;  %v8570_v11 = vlaneseq }
 0xd1b   :  { %5503 = vmatprep.subr.mxu0 %v5223_v40 }
 0xd1c   :  { %5507 = vmatpush1.msra.mxu0 %v5229_v41  ;;  %v5087_v56 = vshrl.u32 %v8570_v11, 7 }
 0xd1d   :  { %5511 = vmatprep.subr.mxu0 %v5235_v28 }
 0xd1e   :  { %5515 = vmatpush1.msra.mxu0 %v5241_v31  ;;  %v5088_v57 = vsub.s32 0, %v5087_v56  ;;  %v5092_v14 = vsub.s32 1, %v5087_v56 }
 0xd1f   :  { %5519 = vmatprep.subr.mxu0 %v5247_v20 }
 0xd20   :  { %5523 = vmatpush1.msra.mxu0 %v5253_v34  ;;  %v5089_v45 = vrot.slane %v5084_v3, %v5088_v57  ;;  %v5093_v51 = vrot.slane %v5084_v3, %v5092_v14 }
 0xd21   :  { %5558 = vmatmul.mubr.f32.vlgmr.msra.gmra.mxu0 %v5174_v5 }
 0xdc7   :  { %v5292_v52 = vpop.f32.mrf.mxu1 }
 0xdc9   :  { %v5294_v10 = vpop.f32.mrf.mxu1 }
 0xdcf   :  { %v5463_v48 = vpop.f32.mrf.mxu1 }
 0xdd0   :  { %v5180_v29 = vpop.f32.mrf.mxu0 }
 0xdd1   :  { %v5181_v4 = vadd.f32 %v5180_v29, %v5089_v45  ;;  %v5465_v54 = vpop.f32.mrf.mxu1 }
 0xdd2   :  { %v5182_v53 = vpop.f32.mrf.mxu0 }
 0xdd3   :  { %v5183_v47 = vadd.f32 %v5182_v53, %v5093_v51  ;;  %v5293_v49 = vadd.f32 %v5292_v52, %v5181_v4 }
 0xdd5   :  { %v5295_v28 = vadd.f32 %v5294_v10, %v5183_v47 }
 0xdd8   :  { %v5381_v27 = vpop.f32.mrf.mxu0 }
 0xdd9   :  { %v5382_v41 = vadd.f32 %v5381_v27, %v5293_v49  ;;  %v5639_v43 = vpop.f32.mrf.mxu1 }
 0xdda   :  { %v5383_v40 = vpop.f32.mrf.mxu0 }
 0xddb   :  { %v5384_v31 = vadd.f32 %v5383_v40, %v5295_v28  ;;  %v5464_v15 = vadd.f32 %v5463_v48, %v5382_v41  ;;  %v5641_v9 = vpop.f32.mrf.mxu1 }
 0xddd   :  { %v5466_v36 = vadd.f32 %v5465_v54, %v5384_v31 }
 0xde1   :  { %v5559_v16 = vpop.f32.mrf.mxu0 }
 0xde2   :  { %v5560_v59 = vadd.f32 %v5559_v16, %v5464_v15 }
 0xde3   :  { %v5561_v17 = vpop.f32.mrf.mxu0 }
 0xde4   :  { %v5640_v24 = vadd.f32 %v5639_v43, %v5560_v59  ;;  %v5562_v37 = vadd.f32 %v5561_v17, %v5466_v36 }
 0xde6   :  { %5644 = vst [vmem:[#allocation7] sm:$0xff] %v5640_v24  ;;  %v5642_v18 = vadd.f32 %v5641_v9, %v5562_v37 }
 0xde8   :  { %5645 = vst [vmem:[#allocation7 + $0x8] sm:$0xff] %v5642_v18 }
 0xde9   :  { %6743 = shalt.err (!%p6740_p0)
}
 0xdea   :  { %5655 = dma.vmem_to_hbm [thread:$0]  %s5653_s30, 256, %s8423_s8, [#allocation4]  }
 0xdeb   :  { %6756 = dma.done.wait [#allocation4], 256  }
 0xdec   :  { %6757 = vsyncadd [#allocation4], 4294967040 }
 0xded   :  { %5667 = vsyncpa [#allocation3], 1 }
 0xdee   :  { %5668 = vsyncpa [#allocation6], 1 }
 0xdef   :  { %5669 = vsyncpa [#allocation4], 1 }

</bundles_post_ra>
